<compile_context>
chip_gen: v7x
topology: tpu7x:2x2x1
jax: 0.10.0
libtpu: 0.0.40
codegen_flags: <defaults>
</compile_context>

<pallas_src>
import functools

import jax
import jax.numpy as jnp
import numpy as np
from jax import lax
from jax.experimental import pallas as pl
from jax.experimental.pallas import tpu as pltpu  # noqa: F401  (TPU backend assumed)

# ---------------- model config (small, consistent with the module) ----------------
B = 2            # batch
TO_LEN = 8       # sequence length (to_len)
TO_DIM = 32      # token dim (to_dim)
LATENT_DIM = 32  # latent_dim
NUM_HEADS = 4    # num_heads
HIDDEN_DIM = 4 * TO_DIM
LN_EPS = 1e-5


def _sum_last2(t):
    """Sum over the last two axes (keepdims), as two chained single-axis reductions."""
    return jnp.sum(jnp.sum(t, axis=-1, keepdims=True), axis=-2, keepdims=True)


def encoder_block_kernel(
    x_ref,
    wq_ref, bq_ref, wk_ref, bk_ref, wv_ref, bv_ref,
    wo_ref, bo_ref,
    g1_ref, be1_ref,
    w1_ref, b1_ref, w2_ref, b2_ref,
    g2_ref, be2_ref,
    out_ref,
    *, batch, seq_len, num_heads,
):
    f32 = jnp.float32
    Bsz, L, H = batch, seq_len, num_heads
    xf = x_ref[...].astype(f32)                        # (B*L, D)
    BL, D = xf.shape
    latent = wq_ref.shape[1]
    d = latent // H

    # ---- TokensToQKV (weights pre-transposed in the wrapper: y = x @ W^T + b) ----
    q = jnp.dot(xf, wq_ref[...], preferred_element_type=f32) + bq_ref[...]
    k = jnp.dot(xf, wk_ref[...], preferred_element_type=f32) + bk_ref[...]
    v = jnp.dot(xf, wv_ref[...], preferred_element_type=f32) + bv_ref[...]

    # Reference module scales scores by 1/d_in (not 1/sqrt(d)); fold it into Q.
    q = q * (1.0 / d)

    # ---- SplitHeads: gather every (batch, head) pair into one leading batch axis ----
    def split_heads(t):
        return jnp.stack(
            [t[b * L:(b + 1) * L, h * d:(h + 1) * d]
             for b in range(Bsz) for h in range(H)],
            axis=0)                                    # (B*H, L, d)

    qh = split_heads(q)
    kh = split_heads(k)
    vh = split_heads(v)

    # ---- Attention: single batched dot_general over the (batch*heads) axis ----
    s = lax.dot_general(qh, kh, (((2,), (2,)), ((0,), (0,))),
                        preferred_element_type=f32)    # (B*H, L, L)
    s = s - jnp.max(s, axis=-1, keepdims=True)
    p = jnp.exp(s)
    p = p * pl.reciprocal(jnp.sum(p, axis=-1, keepdims=True), approx=False)
    oh = lax.dot_general(p, vh, (((2,), (1,)), ((0,), (0,))),
                         preferred_element_type=f32)   # (B*H, L, d)

    # ---- Output projection: per-head Wo^T slabs (pre-split in the wrapper), summed
    #      over heads.  Equivalent to transpose(1,2).reshape(..., H*d) @ Wo^T + bo,
    #      without the lane-axis concatenate. ----
    op = lax.dot_general(oh, wo_ref[...], (((2,), (1,)), ((0,), (0,))),
                         preferred_element_type=f32)   # (B*H, L, D)
    op = op.reshape(Bsz, H, L, D)
    o = op[:, 0]
    for h in range(1, H):
        o = o + op[:, h]                               # (B, L, D)
    o = o.reshape(BL, D) + bo_ref[...]

    # ---- skip + LayerNorm over (L, D) per batch element, one-pass mean/var ----
    def skip_layer_norm(a, b_, g, be):
        z = (a + b_).reshape(Bsz, L, D)
        inv_n = 1.0 / (L * D)
        mu = _sum_last2(z) * inv_n                     # (B, 1, 1)
        var = _sum_last2(z * z) * inv_n - mu * mu
        inv = lax.rsqrt(var + LN_EPS)
        return (z - mu) * inv * g + be                 # (B, L, D)

    y1 = skip_layer_norm(xf, o, g1_ref[...], be1_ref[...])
    y1f = y1.reshape(BL, D)

    # ---- FFN: Linear -> ReLU -> Linear -> Dropout(identity at inference) ----
    h1 = jnp.maximum(
        jnp.dot(y1f, w1_ref[...], preferred_element_type=f32) + b1_ref[...], 0.0)
    f2 = jnp.dot(h1, w2_ref[...], preferred_element_type=f32) + b2_ref[...]
    # TODO(synk): nn.Dropout(0.2) is stochastic in train mode; treated as identity (eval).

    # ---- skip + LayerNorm((L, D)) ----
    y2 = skip_layer_norm(f2, y1f, g2_ref[...], be2_ref[...])   # (B, L, D)
    out_ref[...] = y2.astype(out_ref.dtype)


def encoder_transformer_block(x, params):
    Bsz, L, D = x.shape
    H = NUM_HEADS
    latent = params["wq"].shape[0]
    d = latent // H

    # Wrapper-side layout prep (free XLA reshapes/transposes, done once outside the
    # kernel): pre-transpose all Linear weights, pre-split Wo^T into per-head slabs
    # tiled over batch, flatten x to (B*L, D) rows, give gamma/beta a leading axis.
    wq_t = params["wq"].T                                             # (D, latent)
    wk_t = params["wk"].T
    wv_t = params["wv"].T
    wo_bh = jnp.tile(params["wo"].T.reshape(H, d, D), (Bsz, 1, 1))    # (B*H, d, D)
    w1_t = params["w1"].T                                             # (D, hidden)
    w2_t = params["w2"].T                                             # (hidden, D)
    g1 = params["g1"].reshape(1, L, D)
    be1 = params["be1"].reshape(1, L, D)
    g2 = params["g2"].reshape(1, L, D)
    be2 = params["be2"].reshape(1, L, D)
    xf = x.reshape(Bsz * L, D)

    kernel = functools.partial(
        encoder_block_kernel, batch=Bsz, seq_len=L, num_heads=H)

    # Single invocation (no grid): every ref is the full array resident in VMEM,
    # so weights are single-buffered by construction and there is exactly one
    # pipeline prologue/epilogue regardless of batch size.
    return pl.pallas_call(
        kernel,
        out_shape=jax.ShapeDtypeStruct((Bsz, L, D), jnp.float32),
    )(xf, wq_t, params["bq"], wk_t, params["bk"], wv_t, params["bv"],
      wo_bh, params["bo"], g1, be1,
      w1_t, params["b1"], w2_t, params["b2"], g2, be2)


# ---------------- pure-JAX reference (for a sanity check) ----------------
def reference(x, p):
    q = x @ p["wq"].T + p["bq"]
    k = x @ p["wk"].T + p["bk"]
    v = x @ p["wv"].T + p["bv"]
    Bsz, L, latent = q.shape
    H, d = NUM_HEADS, latent // NUM_HEADS
    qh = q.reshape(Bsz, L, H, d).transpose(0, 2, 1, 3)
    kh = k.reshape(Bsz, L, H, d).transpose(0, 2, 1, 3)
    vh = v.reshape(Bsz, L, H, d).transpose(0, 2, 1, 3)
    attn = jax.nn.softmax(qh @ kh.transpose(0, 1, 3, 2) / d, axis=-1)
    o = (attn @ vh).transpose(0, 2, 1, 3).reshape(Bsz, L, latent)
    o = o @ p["wo"].T + p["bo"]

    def ln(z, g, b):
        mu = jnp.mean(z, axis=(1, 2), keepdims=True)
        var = jnp.mean((z - mu) ** 2, axis=(1, 2), keepdims=True)
        return (z - mu) / jnp.sqrt(var + LN_EPS) * g + b

    y1 = ln(x + o, p["g1"], p["be1"])
    f = jnp.maximum(y1 @ p["w1"].T + p["b1"], 0.0)
    f2 = f @ p["w2"].T + p["b2"]
    return ln(f2 + y1, p["g2"], p["be2"])


def make_params(key):
    ks = jax.random.split(key, 8)
    s = 0.05
    params = {
        "wq": jax.random.normal(ks[0], (LATENT_DIM, TO_DIM), jnp.float32) * s,
        "bq": jax.random.normal(ks[1], (1, LATENT_DIM), jnp.float32) * s,
        "wk": jax.random.normal(ks[2], (LATENT_DIM, TO_DIM), jnp.float32) * s,
        "bk": jax.random.normal(ks[3], (1, LATENT_DIM), jnp.float32) * s,
        "wv": jax.random.normal(ks[4], (LATENT_DIM, TO_DIM), jnp.float32) * s,
        "bv": jax.random.normal(ks[5], (1, LATENT_DIM), jnp.float32) * s,
        "wo": jax.random.normal(ks[6], (TO_DIM, LATENT_DIM), jnp.float32) * s,
        "bo": jax.random.normal(ks[7], (1, TO_DIM), jnp.float32) * s,
        "g1": jnp.ones((TO_LEN, TO_DIM), jnp.float32),
        "be1": jnp.zeros((TO_LEN, TO_DIM), jnp.float32),
        "w1": jax.random.normal(jax.random.PRNGKey(11), (HIDDEN_DIM, TO_DIM), jnp.float32) * s,
        "b1": jax.random.normal(jax.random.PRNGKey(12), (1, HIDDEN_DIM), jnp.float32) * s,
        "w2": jax.random.normal(jax.random.PRNGKey(13), (TO_DIM, HIDDEN_DIM), jnp.float32) * s,
        "b2": jax.random.normal(jax.random.PRNGKey(14), (1, TO_DIM), jnp.float32) * s,
        "g2": jnp.ones((TO_LEN, TO_DIM), jnp.float32),
        "be2": jnp.zeros((TO_LEN, TO_DIM), jnp.float32),
    }
    return params


if __name__ == "__main__":
    key = jax.random.PRNGKey(0)
    kx, kp = jax.random.split(key)
    x = jax.random.normal(kx, (B, TO_LEN, TO_DIM), jnp.float32)
    params = make_params(kp)

    out = encoder_transformer_block(x, params)
    out = jax.block_until_ready(out)

    ref = jax.block_until_ready(reference(x, params))
    np.testing.assert_allclose(np.asarray(out), np.asarray(ref), rtol=2e-3, atol=2e-3)

    print("KERNEL_OK")
</pallas_src>

<mosaic_0001>
module attributes {stable_mosaic.version = 11 : i64} {
  func.func @encoder_block_kernel(%arg0: memref<16x32xf32, #tpu.memory_space<vmem>>, %arg1: memref<32x32xf32, #tpu.memory_space<vmem>>, %arg2: memref<1x32xf32, #tpu.memory_space<vmem>>, %arg3: memref<32x32xf32, #tpu.memory_space<vmem>>, %arg4: memref<1x32xf32, #tpu.memory_space<vmem>>, %arg5: memref<32x32xf32, #tpu.memory_space<vmem>>, %arg6: memref<1x32xf32, #tpu.memory_space<vmem>>, %arg7: memref<8x8x32xf32, #tpu.memory_space<vmem>>, %arg8: memref<1x32xf32, #tpu.memory_space<vmem>>, %arg9: memref<1x8x32xf32, #tpu.memory_space<vmem>>, %arg10: memref<1x8x32xf32, #tpu.memory_space<vmem>>, %arg11: memref<32x128xf32, #tpu.memory_space<vmem>>, %arg12: memref<1x128xf32, #tpu.memory_space<vmem>>, %arg13: memref<128x32xf32, #tpu.memory_space<vmem>>, %arg14: memref<1x32xf32, #tpu.memory_space<vmem>>, %arg15: memref<1x8x32xf32, #tpu.memory_space<vmem>>, %arg16: memref<1x8x32xf32, #tpu.memory_space<vmem>>, %arg17: memref<2x8x32xf32, #tpu.memory_space<vmem>>) attributes {dimension_semantics = [], scalar_prefetch = 0 : i64, scratch_operands = 0 : i64, tpu.core_type = #tpu.core_type<tc>} {
    %c0 = arith.constant 0 : index
    %c0_0 = arith.constant 0 : index
    %0 = vector.load %arg0[%c0, %c0_0] : memref<16x32xf32, #tpu.memory_space<vmem>>, vector<16x32xf32>
    %c0_1 = arith.constant 0 : index
    %c0_2 = arith.constant 0 : index
    %1 = vector.load %arg1[%c0_1, %c0_2] : memref<32x32xf32, #tpu.memory_space<vmem>>, vector<32x32xf32>
    %cst = arith.constant dense<0.000000e+00> : vector<16x32xf32>
    %2 = tpu.matmul %0, %1, %cst {dimension_numbers = #tpu.dot_dimension_numbers<[1], [0], [0], [1], [0, 0, 1, 1], [], []>} : vector<16x32xf32>, vector<32x32xf32>, vector<16x32xf32> -> vector<16x32xf32>
    %c0_3 = arith.constant 0 : index
    %c0_4 = arith.constant 0 : index
    %3 = vector.load %arg2[%c0_3, %c0_4] : memref<1x32xf32, #tpu.memory_space<vmem>>, vector<1x32xf32>
    %4 = vector.broadcast %3 : vector<1x32xf32> to vector<16x32xf32>
    %5 = arith.addf %2, %4 : vector<16x32xf32>
    %c0_5 = arith.constant 0 : index
    %c0_6 = arith.constant 0 : index
    %6 = vector.load %arg3[%c0_5, %c0_6] : memref<32x32xf32, #tpu.memory_space<vmem>>, vector<32x32xf32>
    %cst_7 = arith.constant dense<0.000000e+00> : vector<16x32xf32>
    %7 = tpu.matmul %0, %6, %cst_7 {dimension_numbers = #tpu.dot_dimension_numbers<[1], [0], [0], [1], [0, 0, 1, 1], [], []>} : vector<16x32xf32>, vector<32x32xf32>, vector<16x32xf32> -> vector<16x32xf32>
    %c0_8 = arith.constant 0 : index
    %c0_9 = arith.constant 0 : index
    %8 = vector.load %arg4[%c0_8, %c0_9] : memref<1x32xf32, #tpu.memory_space<vmem>>, vector<1x32xf32>
    %9 = vector.broadcast %8 : vector<1x32xf32> to vector<16x32xf32>
    %10 = arith.addf %7, %9 : vector<16x32xf32>
    %c0_10 = arith.constant 0 : index
    %c0_11 = arith.constant 0 : index
    %11 = vector.load %arg5[%c0_10, %c0_11] : memref<32x32xf32, #tpu.memory_space<vmem>>, vector<32x32xf32>
    %cst_12 = arith.constant dense<0.000000e+00> : vector<16x32xf32>
    %12 = tpu.matmul %0, %11, %cst_12 {dimension_numbers = #tpu.dot_dimension_numbers<[1], [0], [0], [1], [0, 0, 1, 1], [], []>} : vector<16x32xf32>, vector<32x32xf32>, vector<16x32xf32> -> vector<16x32xf32>
    %c0_13 = arith.constant 0 : index
    %c0_14 = arith.constant 0 : index
    %13 = vector.load %arg6[%c0_13, %c0_14] : memref<1x32xf32, #tpu.memory_space<vmem>>, vector<1x32xf32>
    %14 = vector.broadcast %13 : vector<1x32xf32> to vector<16x32xf32>
    %15 = arith.addf %12, %14 : vector<16x32xf32>
    %cst_15 = arith.constant 1.250000e-01 : f32
    %16 = vector.broadcast %cst_15 : f32 to vector<16x32xf32>
    %17 = arith.mulf %5, %16 : vector<16x32xf32>
    %18 = vector.extract_strided_slice %17 {offsets = [0, 0], sizes = [8, 8], strides = [1, 1]} : vector<16x32xf32> to vector<8x8xf32>
    %19 = vector.extract_strided_slice %17 {offsets = [0, 8], sizes = [8, 8], strides = [1, 1]} : vector<16x32xf32> to vector<8x8xf32>
    %20 = vector.extract_strided_slice %17 {offsets = [0, 16], sizes = [8, 8], strides = [1, 1]} : vector<16x32xf32> to vector<8x8xf32>
    %21 = vector.extract_strided_slice %17 {offsets = [0, 24], sizes = [8, 8], strides = [1, 1]} : vector<16x32xf32> to vector<8x8xf32>
    %22 = vector.extract_strided_slice %17 {offsets = [8, 0], sizes = [8, 8], strides = [1, 1]} : vector<16x32xf32> to vector<8x8xf32>
    %23 = vector.extract_strided_slice %17 {offsets = [8, 8], sizes = [8, 8], strides = [1, 1]} : vector<16x32xf32> to vector<8x8xf32>
    %24 = vector.extract_strided_slice %17 {offsets = [8, 16], sizes = [8, 8], strides = [1, 1]} : vector<16x32xf32> to vector<8x8xf32>
    %25 = vector.extract_strided_slice %17 {offsets = [8, 24], sizes = [8, 8], strides = [1, 1]} : vector<16x32xf32> to vector<8x8xf32>
    %26 = vector.shape_cast %18 : vector<8x8xf32> to vector<1x8x8xf32>
    %27 = vector.shape_cast %19 : vector<8x8xf32> to vector<1x8x8xf32>
    %28 = vector.shape_cast %20 : vector<8x8xf32> to vector<1x8x8xf32>
    %29 = vector.shape_cast %21 : vector<8x8xf32> to vector<1x8x8xf32>
    %30 = vector.shape_cast %22 : vector<8x8xf32> to vector<1x8x8xf32>
    %31 = vector.shape_cast %23 : vector<8x8xf32> to vector<1x8x8xf32>
    %32 = vector.shape_cast %24 : vector<8x8xf32> to vector<1x8x8xf32>
    %33 = vector.shape_cast %25 : vector<8x8xf32> to vector<1x8x8xf32>
    %34 = tpu.concatenate %26, %27, %28, %29, %30, %31, %32, %33 in 0 : vector<1x8x8xf32>, vector<1x8x8xf32>, vector<1x8x8xf32>, vector<1x8x8xf32>, vector<1x8x8xf32>, vector<1x8x8xf32>, vector<1x8x8xf32>, vector<1x8x8xf32> -> vector<8x8x8xf32>
    %35 = vector.extract_strided_slice %10 {offsets = [0, 0], sizes = [8, 8], strides = [1, 1]} : vector<16x32xf32> to vector<8x8xf32>
    %36 = vector.extract_strided_slice %10 {offsets = [0, 8], sizes = [8, 8], strides = [1, 1]} : vector<16x32xf32> to vector<8x8xf32>
    %37 = vector.extract_strided_slice %10 {offsets = [0, 16], sizes = [8, 8], strides = [1, 1]} : vector<16x32xf32> to vector<8x8xf32>
    %38 = vector.extract_strided_slice %10 {offsets = [0, 24], sizes = [8, 8], strides = [1, 1]} : vector<16x32xf32> to vector<8x8xf32>
    %39 = vector.extract_strided_slice %10 {offsets = [8, 0], sizes = [8, 8], strides = [1, 1]} : vector<16x32xf32> to vector<8x8xf32>
    %40 = vector.extract_strided_slice %10 {offsets = [8, 8], sizes = [8, 8], strides = [1, 1]} : vector<16x32xf32> to vector<8x8xf32>
    %41 = vector.extract_strided_slice %10 {offsets = [8, 16], sizes = [8, 8], strides = [1, 1]} : vector<16x32xf32> to vector<8x8xf32>
    %42 = vector.extract_strided_slice %10 {offsets = [8, 24], sizes = [8, 8], strides = [1, 1]} : vector<16x32xf32> to vector<8x8xf32>
    %43 = vector.shape_cast %35 : vector<8x8xf32> to vector<1x8x8xf32>
    %44 = vector.shape_cast %36 : vector<8x8xf32> to vector<1x8x8xf32>
    %45 = vector.shape_cast %37 : vector<8x8xf32> to vector<1x8x8xf32>
    %46 = vector.shape_cast %38 : vector<8x8xf32> to vector<1x8x8xf32>
    %47 = vector.shape_cast %39 : vector<8x8xf32> to vector<1x8x8xf32>
    %48 = vector.shape_cast %40 : vector<8x8xf32> to vector<1x8x8xf32>
    %49 = vector.shape_cast %41 : vector<8x8xf32> to vector<1x8x8xf32>
    %50 = vector.shape_cast %42 : vector<8x8xf32> to vector<1x8x8xf32>
    %51 = tpu.concatenate %43, %44, %45, %46, %47, %48, %49, %50 in 0 : vector<1x8x8xf32>, vector<1x8x8xf32>, vector<1x8x8xf32>, vector<1x8x8xf32>, vector<1x8x8xf32>, vector<1x8x8xf32>, vector<1x8x8xf32>, vector<1x8x8xf32> -> vector<8x8x8xf32>
    %52 = vector.extract_strided_slice %15 {offsets = [0, 0], sizes = [8, 8], strides = [1, 1]} : vector<16x32xf32> to vector<8x8xf32>
    %53 = vector.extract_strided_slice %15 {offsets = [0, 8], sizes = [8, 8], strides = [1, 1]} : vector<16x32xf32> to vector<8x8xf32>
    %54 = vector.extract_strided_slice %15 {offsets = [0, 16], sizes = [8, 8], strides = [1, 1]} : vector<16x32xf32> to vector<8x8xf32>
    %55 = vector.extract_strided_slice %15 {offsets = [0, 24], sizes = [8, 8], strides = [1, 1]} : vector<16x32xf32> to vector<8x8xf32>
    %56 = vector.extract_strided_slice %15 {offsets = [8, 0], sizes = [8, 8], strides = [1, 1]} : vector<16x32xf32> to vector<8x8xf32>
    %57 = vector.extract_strided_slice %15 {offsets = [8, 8], sizes = [8, 8], strides = [1, 1]} : vector<16x32xf32> to vector<8x8xf32>
    %58 = vector.extract_strided_slice %15 {offsets = [8, 16], sizes = [8, 8], strides = [1, 1]} : vector<16x32xf32> to vector<8x8xf32>
    %59 = vector.extract_strided_slice %15 {offsets = [8, 24], sizes = [8, 8], strides = [1, 1]} : vector<16x32xf32> to vector<8x8xf32>
    %60 = vector.shape_cast %52 : vector<8x8xf32> to vector<1x8x8xf32>
    %61 = vector.shape_cast %53 : vector<8x8xf32> to vector<1x8x8xf32>
    %62 = vector.shape_cast %54 : vector<8x8xf32> to vector<1x8x8xf32>
    %63 = vector.shape_cast %55 : vector<8x8xf32> to vector<1x8x8xf32>
    %64 = vector.shape_cast %56 : vector<8x8xf32> to vector<1x8x8xf32>
    %65 = vector.shape_cast %57 : vector<8x8xf32> to vector<1x8x8xf32>
    %66 = vector.shape_cast %58 : vector<8x8xf32> to vector<1x8x8xf32>
    %67 = vector.shape_cast %59 : vector<8x8xf32> to vector<1x8x8xf32>
    %68 = tpu.concatenate %60, %61, %62, %63, %64, %65, %66, %67 in 0 : vector<1x8x8xf32>, vector<1x8x8xf32>, vector<1x8x8xf32>, vector<1x8x8xf32>, vector<1x8x8xf32>, vector<1x8x8xf32>, vector<1x8x8xf32>, vector<1x8x8xf32> -> vector<8x8x8xf32>
    %cst_16 = arith.constant dense<0.000000e+00> : vector<8x8x8xf32>
    %69 = tpu.matmul %34, %51, %cst_16 {dimension_numbers = #tpu.dot_dimension_numbers<[2], [2], [1], [1], [0, 0, 0, 1, 1, 1], [0], [0]>} : vector<8x8x8xf32>, vector<8x8x8xf32>, vector<8x8x8xf32> -> vector<8x8x8xf32>
    %cst_17 = arith.constant dense<0xFF800000> : vector<8x8xf32>
    %70 = vector.multi_reduction <maximumf>, %69, %cst_17 [2] : vector<8x8x8xf32> to vector<8x8xf32>
    %71 = vector.shape_cast %70 : vector<8x8xf32> to vector<8x8x1xf32>
    %72 = vector.broadcast %71 : vector<8x8x1xf32> to vector<8x8x8xf32>
    %73 = arith.subf %69, %72 : vector<8x8x8xf32>
    %74 = math.exp %73 : vector<8x8x8xf32>
    %cst_18 = arith.constant dense<0.000000e+00> : vector<8x8xf32>
    %75 = vector.multi_reduction <add>, %74, %cst_18 [2] : vector<8x8x8xf32> to vector<8x8xf32>
    %76 = vector.shape_cast %75 : vector<8x8xf32> to vector<8x8x1xf32>
    %77 = tpu.reciprocal %76 : vector<8x8x1xf32> -> vector<8x8x1xf32>
    %78 = vector.broadcast %77 : vector<8x8x1xf32> to vector<8x8x8xf32>
    %79 = arith.mulf %74, %78 : vector<8x8x8xf32>
    %cst_19 = arith.constant dense<0.000000e+00> : vector<8x8x8xf32>
    %80 = tpu.matmul %79, %68, %cst_19 {dimension_numbers = #tpu.dot_dimension_numbers<[2], [1], [1], [2], [0, 0, 0, 1, 1, 2], [0], [0]>} : vector<8x8x8xf32>, vector<8x8x8xf32>, vector<8x8x8xf32> -> vector<8x8x8xf32>
    %c0_20 = arith.constant 0 : index
    %c0_21 = arith.constant 0 : index
    %c0_22 = arith.constant 0 : index
    %81 = vector.load %arg7[%c0_20, %c0_21, %c0_22] : memref<8x8x32xf32, #tpu.memory_space<vmem>>, vector<8x8x32xf32>
    %cst_23 = arith.constant dense<0.000000e+00> : vector<8x8x32xf32>
    %82 = tpu.matmul %80, %81, %cst_23 {dimension_numbers = #tpu.dot_dimension_numbers<[2], [1], [1], [2], [0, 0, 0, 1, 1, 2], [0], [0]>} : vector<8x8x8xf32>, vector<8x8x32xf32>, vector<8x8x32xf32> -> vector<8x8x32xf32>
    %83 = vector.shape_cast %82 : vector<8x8x32xf32> to vector<2x4x8x32xf32>
    %84 = vector.extract_strided_slice %83 {offsets = [0, 0, 0, 0], sizes = [2, 1, 8, 32], strides = [1, 1, 1, 1]} : vector<2x4x8x32xf32> to vector<2x1x8x32xf32>
    %85 = vector.shape_cast %84 : vector<2x1x8x32xf32> to vector<2x8x32xf32>
    %86 = vector.extract_strided_slice %83 {offsets = [0, 1, 0, 0], sizes = [2, 1, 8, 32], strides = [1, 1, 1, 1]} : vector<2x4x8x32xf32> to vector<2x1x8x32xf32>
    %87 = vector.shape_cast %86 : vector<2x1x8x32xf32> to vector<2x8x32xf32>
    %88 = arith.addf %85, %87 : vector<2x8x32xf32>
    %89 = vector.extract_strided_slice %83 {offsets = [0, 2, 0, 0], sizes = [2, 1, 8, 32], strides = [1, 1, 1, 1]} : vector<2x4x8x32xf32> to vector<2x1x8x32xf32>
    %90 = vector.shape_cast %89 : vector<2x1x8x32xf32> to vector<2x8x32xf32>
    %91 = arith.addf %88, %90 : vector<2x8x32xf32>
    %92 = vector.extract_strided_slice %83 {offsets = [0, 3, 0, 0], sizes = [2, 1, 8, 32], strides = [1, 1, 1, 1]} : vector<2x4x8x32xf32> to vector<2x1x8x32xf32>
    %93 = vector.shape_cast %92 : vector<2x1x8x32xf32> to vector<2x8x32xf32>
    %94 = arith.addf %91, %93 : vector<2x8x32xf32>
    %95 = vector.shape_cast %94 : vector<2x8x32xf32> to vector<16x32xf32>
    %c0_24 = arith.constant 0 : index
    %c0_25 = arith.constant 0 : index
    %96 = vector.load %arg8[%c0_24, %c0_25] : memref<1x32xf32, #tpu.memory_space<vmem>>, vector<1x32xf32>
    %97 = vector.broadcast %96 : vector<1x32xf32> to vector<16x32xf32>
    %98 = arith.addf %95, %97 : vector<16x32xf32>
    %c0_26 = arith.constant 0 : index
    %c0_27 = arith.constant 0 : index
    %c0_28 = arith.constant 0 : index
    %99 = vector.load %arg9[%c0_26, %c0_27, %c0_28] : memref<1x8x32xf32, #tpu.memory_space<vmem>>, vector<1x8x32xf32>
    %c0_29 = arith.constant 0 : index
    %c0_30 = arith.constant 0 : index
    %c0_31 = arith.constant 0 : index
    %100 = vector.load %arg10[%c0_29, %c0_30, %c0_31] : memref<1x8x32xf32, #tpu.memory_space<vmem>>, vector<1x8x32xf32>
    %101 = arith.addf %0, %98 : vector<16x32xf32>
    %102 = vector.shape_cast %101 : vector<16x32xf32> to vector<2x8x32xf32>
    %cst_32 = arith.constant dense<0.000000e+00> : vector<2x8xf32>
    %103 = vector.multi_reduction <add>, %102, %cst_32 [2] : vector<2x8x32xf32> to vector<2x8xf32>
    %104 = vector.shape_cast %103 : vector<2x8xf32> to vector<2x8x1xf32>
    %cst_33 = arith.constant dense<0.000000e+00> : vector<2x1xf32>
    %105 = vector.multi_reduction <add>, %104, %cst_33 [1] : vector<2x8x1xf32> to vector<2x1xf32>
    %106 = vector.shape_cast %105 : vector<2x1xf32> to vector<2x1x1xf32>
    %cst_34 = arith.constant 3.906250e-03 : f32
    %107 = vector.broadcast %cst_34 : f32 to vector<2x1x1xf32>
    %108 = arith.mulf %106, %107 : vector<2x1x1xf32>
    %109 = arith.mulf %102, %102 : vector<2x8x32xf32>
    %cst_35 = arith.constant dense<0.000000e+00> : vector<2x8xf32>
    %110 = vector.multi_reduction <add>, %109, %cst_35 [2] : vector<2x8x32xf32> to vector<2x8xf32>
    %111 = vector.shape_cast %110 : vector<2x8xf32> to vector<2x8x1xf32>
    %cst_36 = arith.constant dense<0.000000e+00> : vector<2x1xf32>
    %112 = vector.multi_reduction <add>, %111, %cst_36 [1] : vector<2x8x1xf32> to vector<2x1xf32>
    %113 = vector.shape_cast %112 : vector<2x1xf32> to vector<2x1x1xf32>
    %cst_37 = arith.constant 3.906250e-03 : f32
    %114 = vector.broadcast %cst_37 : f32 to vector<2x1x1xf32>
    %115 = arith.mulf %113, %114 : vector<2x1x1xf32>
    %116 = arith.mulf %108, %108 : vector<2x1x1xf32>
    %117 = arith.subf %115, %116 : vector<2x1x1xf32>
    %cst_38 = arith.constant 9.99999974E-6 : f32
    %118 = vector.broadcast %cst_38 : f32 to vector<2x1x1xf32>
    %119 = arith.addf %117, %118 : vector<2x1x1xf32>
    %120 = math.rsqrt %119 : vector<2x1x1xf32>
    %121 = vector.broadcast %108 : vector<2x1x1xf32> to vector<2x8x32xf32>
    %122 = arith.subf %102, %121 : vector<2x8x32xf32>
    %123 = vector.broadcast %120 : vector<2x1x1xf32> to vector<2x8x32xf32>
    %124 = arith.mulf %122, %123 : vector<2x8x32xf32>
    %125 = vector.broadcast %99 : vector<1x8x32xf32> to vector<2x8x32xf32>
    %126 = arith.mulf %124, %125 : vector<2x8x32xf32>
    %127 = vector.broadcast %100 : vector<1x8x32xf32> to vector<2x8x32xf32>
    %128 = arith.addf %126, %127 : vector<2x8x32xf32>
    %129 = vector.shape_cast %128 : vector<2x8x32xf32> to vector<16x32xf32>
    %c0_39 = arith.constant 0 : index
    %c0_40 = arith.constant 0 : index
    %130 = vector.load %arg11[%c0_39, %c0_40] : memref<32x128xf32, #tpu.memory_space<vmem>>, vector<32x128xf32>
    %cst_41 = arith.constant dense<0.000000e+00> : vector<16x128xf32>
    %131 = tpu.matmul %129, %130, %cst_41 {dimension_numbers = #tpu.dot_dimension_numbers<[1], [0], [0], [1], [0, 0, 1, 1], [], []>} : vector<16x32xf32>, vector<32x128xf32>, vector<16x128xf32> -> vector<16x128xf32>
    %c0_42 = arith.constant 0 : index
    %c0_43 = arith.constant 0 : index
    %132 = vector.load %arg12[%c0_42, %c0_43] : memref<1x128xf32, #tpu.memory_space<vmem>>, vector<1x128xf32>
    %133 = vector.broadcast %132 : vector<1x128xf32> to vector<16x128xf32>
    %134 = arith.addf %131, %133 : vector<16x128xf32>
    %cst_44 = arith.constant 0.000000e+00 : f32
    %135 = vector.broadcast %cst_44 : f32 to vector<16x128xf32>
    %136 = arith.maximumf %134, %135 : vector<16x128xf32>
    %c0_45 = arith.constant 0 : index
    %c0_46 = arith.constant 0 : index
    %137 = vector.load %arg13[%c0_45, %c0_46] : memref<128x32xf32, #tpu.memory_space<vmem>>, vector<128x32xf32>
    %cst_47 = arith.constant dense<0.000000e+00> : vector<16x32xf32>
    %138 = tpu.matmul %136, %137, %cst_47 {dimension_numbers = #tpu.dot_dimension_numbers<[1], [0], [0], [1], [0, 0, 1, 1], [], []>} : vector<16x128xf32>, vector<128x32xf32>, vector<16x32xf32> -> vector<16x32xf32>
    %c0_48 = arith.constant 0 : index
    %c0_49 = arith.constant 0 : index
    %139 = vector.load %arg14[%c0_48, %c0_49] : memref<1x32xf32, #tpu.memory_space<vmem>>, vector<1x32xf32>
    %140 = vector.broadcast %139 : vector<1x32xf32> to vector<16x32xf32>
    %141 = arith.addf %138, %140 : vector<16x32xf32>
    %c0_50 = arith.constant 0 : index
    %c0_51 = arith.constant 0 : index
    %c0_52 = arith.constant 0 : index
    %142 = vector.load %arg15[%c0_50, %c0_51, %c0_52] : memref<1x8x32xf32, #tpu.memory_space<vmem>>, vector<1x8x32xf32>
    %c0_53 = arith.constant 0 : index
    %c0_54 = arith.constant 0 : index
    %c0_55 = arith.constant 0 : index
    %143 = vector.load %arg16[%c0_53, %c0_54, %c0_55] : memref<1x8x32xf32, #tpu.memory_space<vmem>>, vector<1x8x32xf32>
    %144 = arith.addf %141, %129 : vector<16x32xf32>
    %145 = vector.shape_cast %144 : vector<16x32xf32> to vector<2x8x32xf32>
    %cst_56 = arith.constant dense<0.000000e+00> : vector<2x8xf32>
    %146 = vector.multi_reduction <add>, %145, %cst_56 [2] : vector<2x8x32xf32> to vector<2x8xf32>
    %147 = vector.shape_cast %146 : vector<2x8xf32> to vector<2x8x1xf32>
    %cst_57 = arith.constant dense<0.000000e+00> : vector<2x1xf32>
    %148 = vector.multi_reduction <add>, %147, %cst_57 [1] : vector<2x8x1xf32> to vector<2x1xf32>
    %149 = vector.shape_cast %148 : vector<2x1xf32> to vector<2x1x1xf32>
    %cst_58 = arith.constant 3.906250e-03 : f32
    %150 = vector.broadcast %cst_58 : f32 to vector<2x1x1xf32>
    %151 = arith.mulf %149, %150 : vector<2x1x1xf32>
    %152 = arith.mulf %145, %145 : vector<2x8x32xf32>
    %cst_59 = arith.constant dense<0.000000e+00> : vector<2x8xf32>
    %153 = vector.multi_reduction <add>, %152, %cst_59 [2] : vector<2x8x32xf32> to vector<2x8xf32>
    %154 = vector.shape_cast %153 : vector<2x8xf32> to vector<2x8x1xf32>
    %cst_60 = arith.constant dense<0.000000e+00> : vector<2x1xf32>
    %155 = vector.multi_reduction <add>, %154, %cst_60 [1] : vector<2x8x1xf32> to vector<2x1xf32>
    %156 = vector.shape_cast %155 : vector<2x1xf32> to vector<2x1x1xf32>
    %cst_61 = arith.constant 3.906250e-03 : f32
    %157 = vector.broadcast %cst_61 : f32 to vector<2x1x1xf32>
    %158 = arith.mulf %156, %157 : vector<2x1x1xf32>
    %159 = arith.mulf %151, %151 : vector<2x1x1xf32>
    %160 = arith.subf %158, %159 : vector<2x1x1xf32>
    %cst_62 = arith.constant 9.99999974E-6 : f32
    %161 = vector.broadcast %cst_62 : f32 to vector<2x1x1xf32>
    %162 = arith.addf %160, %161 : vector<2x1x1xf32>
    %163 = math.rsqrt %162 : vector<2x1x1xf32>
    %164 = vector.broadcast %151 : vector<2x1x1xf32> to vector<2x8x32xf32>
    %165 = arith.subf %145, %164 : vector<2x8x32xf32>
    %166 = vector.broadcast %163 : vector<2x1x1xf32> to vector<2x8x32xf32>
    %167 = arith.mulf %165, %166 : vector<2x8x32xf32>
    %168 = vector.broadcast %142 : vector<1x8x32xf32> to vector<2x8x32xf32>
    %169 = arith.mulf %167, %168 : vector<2x8x32xf32>
    %170 = vector.broadcast %143 : vector<1x8x32xf32> to vector<2x8x32xf32>
    %171 = arith.addf %169, %170 : vector<2x8x32xf32>
    %c0_63 = arith.constant 0 : index
    %c0_64 = arith.constant 0 : index
    %c0_65 = arith.constant 0 : index
    %172 = vector.load %arg17[%c0_63, %c0_64, %c0_65] : memref<2x8x32xf32, #tpu.memory_space<vmem>>, vector<2x8x32xf32>
    tpu.vector_store %arg17[%c0_63, %c0_64, %c0_65], %171 {strides = array<i32>} : memref<2x8x32xf32, #tpu.memory_space<vmem>>, vector<2x8x32xf32>,
    return
  }
}

</mosaic_0001>

<bundles_post_ra>
// kernel: tpu_custom_call.1
= control target key start
LH: loop header
LB: loop body
LE: loop exit
PB: predicated region body
PF: predicated region fallthrough
CT: control target
= control target key end

     0   :  { %s3932_s0 = inlined_call_operand.hbm [shape: f32[16,32], index: 0, kind: input, shape index: {}]   ;;  %s3933_s1 = inlined_call_operand.vmem [shape: f32[32,32], index: 1, kind: input, shape index: {}]   ;;  %s3934_s2 = inlined_call_operand.hbm [shape: f32[1,32], index: 2, kind: input, shape index: {}]   ;;  %s3935_s3 = inlined_call_operand.vmem [shape: f32[32,32], index: 3, kind: input, shape index: {}]   ;;  %s3936_s4 = inlined_call_operand.hbm [shape: f32[1,32], index: 4, kind: input, shape index: {}]   ;;  %s3937_s5 = inlined_call_operand.vmem [shape: f32[32,32], index: 5, kind: input, shape index: {}]   ;;  %s3938_s6 = inlined_call_operand.hbm [shape: f32[1,32], index: 6, kind: input, shape index: {}]   ;;  %s3939_s7 = inlined_call_operand.vmem [shape: f32[8,8,32], index: 7, kind: input, shape index: {}]   ;;  %s3940_s8 = inlined_call_operand.hbm [shape: f32[1,32], index: 8, kind: input, shape index: {}]   ;;  %s3941_s9 = inlined_call_operand.vmem [shape: f32[1,8,32], index: 9, kind: input, shape index: {}]   ;;  %s3942_s10 = inlined_call_operand.vmem [shape: f32[1,8,32], index: 10, kind: input, shape index: {}]   ;;  %s3943_s11 = inlined_call_operand.hbm [shape: f32[32,128], index: 11, kind: input, shape index: {}]   ;;  %s3944_s12 = inlined_call_operand.hbm [shape: f32[1,128], index: 12, kind: input, shape index: {}]   ;;  %s3945_s13 = inlined_call_operand.vmem [shape: f32[128,32], index: 13, kind: input, shape index: {}]   ;;  %s3946_s14 = inlined_call_operand.hbm [shape: f32[1,32], index: 14, kind: input, shape index: {}]   ;;  %s3947_s15 = inlined_call_operand.vmem [shape: f32[1,8,32], index: 15, kind: input, shape index: {}]   ;;  %s3948_s16 = inlined_call_operand.hbm [shape: f32[1,8,32], index: 16, kind: input, shape index: {}]   ;;  %s3949_s17 = inlined_call_operand.hbm [shape: f32[2,8,32], index: 17, kind: output, shape index: {}]  }
   0x1   :  { %3952 = sst [smem:[#allocation24_spill]] %s3932_s0 }
   0x2   :  { %3953 = sst [smem:[#allocation25_spill]] %s3933_s1 }
   0x3   :  { %22 = vsyncpa [#allocation3], 0 }
   0x4   :  { %23 = vsyncpa [#allocation6], 0 }
   0x5   :  { %24 = vsyncpa [#allocation9], 0 }
   0x6   :  { %25 = vsyncpa [#allocation12], 0 }
   0x7   :  { %26 = vsyncpa [#allocation15], 0 }
   0x8   :  { %27 = vsyncpa [#allocation4], 0  ;;  %s3381_s24 = smov [#allocation5]   ;;  %s3382_s26 = smov [#allocation8]  }
   0x9   :  { %s48_s25 = sshll.u32 %s3381_s24, 4  ;;  %s72_s27 = sshll.u32 %s3382_s26, 4  ;;  %s49_s25 = int_to_ptr.vmem [resolvable:$true] %s48_s25  ;;  %s73_s27 = int_to_ptr.vmem [resolvable:$true] %s72_s27 }
   0xa   :  { %s3149_s0 = scalar_lea.hbm %s3934_s2, 16 }
   0xb   :  { %p3150_p0 = scmp.ne.s32.totalorder %s3934_s2, %s3149_s0  ;;  %p3153_p1 = scmp.lt.u32.totalorder %s3149_s0, %s3934_s2 }
   0xd   :  { %p3155_p2 = pnand %p3153_p1, %p3150_p0 }
   0xf   :  { %3158 = shalt.err (!%p3155_p2)
}
  0x10   :  { %s3159_s20 = scalar_lea.vmem %s49_s25, 16  ;;  %s3163_s21 = scalar_lea.vmem %s49_s25, 32 }
  0x11   :  { %p3160_p3 = scmp.ne.s32.totalorder %s49_s25, %s3159_s20  ;;  %p3164_p4 = scmp.lt.s32.totalorder %s49_s25, %s49_s25 }
  0x12   :  { %p3165_p5 = scmp.lt.s32.totalorder %s3163_s21, %s3159_s20 }
  0x14   :  { %p3166_p6 = por %p3165_p5, %p3164_p4 }
  0x16   :  { %p3167_p7 = pnand %p3166_p6, %p3160_p3 }
  0x18   :  { %3170 = shalt.err (!%p3167_p7)
}
  0x19   :  { %51 = dma.hbm_to_vmem [thread:$0]  %s3934_s2, 16, %s49_s25, [#allocation6]  }
  0x1a   :  { %s3171_s28 = scalar_lea.hbm %s3938_s6, 16 }
  0x1b   :  { %p3172_p8 = scmp.ne.s32.totalorder %s3938_s6, %s3171_s28  ;;  %p3175_p9 = scmp.lt.u32.totalorder %s3171_s28, %s3938_s6 }
  0x1d   :  { %p3177_p10 = pnand %p3175_p9, %p3172_p8 }
  0x1f   :  { %3180 = shalt.err (!%p3177_p10)
}
  0x20   :  { %s3181_s19 = scalar_lea.vmem %s73_s27, 16  ;;  %s3185_s1 = scalar_lea.vmem %s73_s27, 32 }
  0x21   :  { %p3182_p11 = scmp.ne.s32.totalorder %s73_s27, %s3181_s19  ;;  %p3186_p12 = scmp.lt.s32.totalorder %s73_s27, %s73_s27 }
  0x22   :  { %p3187_p13 = scmp.lt.s32.totalorder %s3185_s1, %s3181_s19 }
  0x24   :  { %p3188_p0 = por %p3187_p13, %p3186_p12 }
  0x26   :  { %p3189_p1 = pnand %p3188_p0, %p3182_p11 }
  0x28   :  { %3192 = shalt.err (!%p3189_p1)
}
  0x29   :  { %75 = dma.hbm_to_vmem [thread:$0]  %s3938_s6, 16, %s73_s27, [#allocation9]  }
  0x2a   :  { %s3383_s20 = smov [#allocation11]   ;;  %s3384_s22 = smov [#allocation14]  }
  0x2b   :  { %s97_s21 = sshll.u32 %s3383_s20, 4  ;;  %s122_s23 = sshll.u32 %s3384_s22, 4  ;;  %s98_s21 = int_to_ptr.vmem [resolvable:$true] %s97_s21  ;;  %s3512_s23 = int_to_ptr.vmem [resolvable:$true] %s122_s23 }
  0x2c   :  { %s3193_s28 = scalar_lea.hbm %s3943_s11, 512 }
  0x2d   :  { %p3194_p2 = scmp.ne.s32.totalorder %s3943_s11, %s3193_s28  ;;  %p3197_p3 = scmp.lt.u32.totalorder %s3193_s28, %s3943_s11 }
  0x2f   :  { %p3199_p4 = pnand %p3197_p3, %p3194_p2 }
  0x31   :  { %3202 = shalt.err (!%p3199_p4)
}
  0x32   :  { %s3203_s6 = scalar_lea.vmem %s98_s21, 512  ;;  %p3208_p6 = scmp.lt.s32.totalorder %s98_s21, %s98_s21 }
  0x33   :  { %p3204_p5 = scmp.ne.s32.totalorder %s98_s21, %s3203_s6  ;;  %p3209_p7 = scmp.lt.s32.totalorder %s3203_s6, %s3203_s6 }
  0x35   :  { %p3210_p8 = por %p3209_p7, %p3208_p6 }
  0x37   :  { %p3211_p9 = pnand %p3210_p8, %p3204_p5 }
  0x39   :  { %3214 = shalt.err (!%p3211_p9)
}
  0x3a   :  { %s3385_s27 = smov 128   ;;  %s3386_s19 = smov 8  }
  0x3b   :  { %103 = dma.hbm_to_vmem [thread:$0]  %s3943_s11, 512, %s98_s21, [#allocation12], %s3385_s27, %s3385_s27, %s3386_s19  }
  0x3c   :  { %s3215_s22 = scalar_lea.hbm %s3946_s14, 16 }
  0x3d   :  { %p3216_p10 = scmp.ne.s32.totalorder %s3946_s14, %s3215_s22  ;;  %p3219_p11 = scmp.lt.u32.totalorder %s3215_s22, %s3946_s14 }
  0x3f   :  { %p3221_p12 = pnand %p3219_p11, %p3216_p10 }
  0x41   :  { %3224 = shalt.err (!%p3221_p12)
}
  0x42   :  { %s3225_s0 = scalar_lea.vmem %s3512_s23, 16  ;;  %s3229_s11 = scalar_lea.vmem %s3512_s23, 32 }
  0x43   :  { %p3226_p13 = scmp.ne.s32.totalorder %s3512_s23, %s3225_s0  ;;  %p3230_p0 = scmp.lt.s32.totalorder %s3512_s23, %s3512_s23 }
  0x44   :  { %p3231_p1 = scmp.lt.s32.totalorder %s3229_s11, %s3225_s0 }
  0x46   :  { %p3232_p2 = por %p3231_p1, %p3230_p0 }
  0x48   :  { %p3233_p3 = pnand %p3232_p2, %p3226_p13 }
  0x4a   :  { %3236 = shalt.err (!%p3233_p3)
}
  0x4b   :  { %125 = dma.hbm_to_vmem [thread:$0]  %s3946_s14, 16, %s3512_s23, [#allocation15]  }
  0x4c   :  { %s3387_s18 = smov [#allocation2]   ;;  %s3388_s1 = smov [#allocation7]  }
  0x4d   :  { %s33_s6 = sshll.u32 %s3387_s18, 4  ;;  %s60_s2 = sshll.u32 %s3388_s1, 4  ;;  %s34_s6 = int_to_ptr.vmem [resolvable:$true] %s33_s6  ;;  %s61_s2 = int_to_ptr.vmem [resolvable:$true] %s60_s2 }
  0x4e   :  { %s3954_s22 = sld [smem:[#allocation24_spill]] }
  0x54   :  { %s3237_s24 = scalar_lea.hbm %s3954_s22, 256 }
  0x55   :  { %p3238_p4 = scmp.ne.s32.totalorder %s3954_s22, %s3237_s24  ;;  %p3241_p5 = scmp.lt.u32.totalorder %s3237_s24, %s3954_s22 }
  0x57   :  { %p3243_p6 = pnand %p3241_p5, %p3238_p4 }
  0x59   :  { %3246 = shalt.err (!%p3243_p6)
}
  0x5a   :  { %s3247_s14 = scalar_lea.vmem %s34_s6, 256  ;;  %p3252_p8 = scmp.lt.s32.totalorder %s34_s6, %s34_s6 }
  0x5b   :  { %p3248_p7 = scmp.ne.s32.totalorder %s34_s6, %s3247_s14  ;;  %p3253_p9 = scmp.lt.s32.totalorder %s3247_s14, %s3247_s14 }
  0x5d   :  { %p3254_p10 = por %p3253_p9, %p3252_p8 }
  0x5f   :  { %p3255_p11 = pnand %p3254_p10, %p3248_p7 }
  0x61   :  { %3258 = shalt.err (!%p3255_p11)
}
  0x62   :  { %39 = dma.hbm_to_vmem [thread:$0]  %s3954_s22, 256, %s34_s6, [#allocation3], %s3385_s27, %s3385_s27, %s3386_s19  }
  0x63   :  { %s3259_s18 = scalar_lea.hbm %s3936_s4, 16 }
  0x64   :  { %p3260_p12 = scmp.ne.s32.totalorder %s3936_s4, %s3259_s18  ;;  %p3263_p13 = scmp.lt.u32.totalorder %s3259_s18, %s3936_s4 }
  0x66   :  { %p3265_p0 = pnand %p3263_p13, %p3260_p12 }
  0x68   :  { %3268 = shalt.err (!%p3265_p0)
}
  0x69   :  { %s3269_s26 = scalar_lea.vmem %s61_s2, 16  ;;  %s3273_s28 = scalar_lea.vmem %s61_s2, 32 }
  0x6a   :  { %p3270_p1 = scmp.ne.s32.totalorder %s61_s2, %s3269_s26  ;;  %p3274_p2 = scmp.lt.s32.totalorder %s61_s2, %s61_s2 }
  0x6b   :  { %p3275_p3 = scmp.lt.s32.totalorder %s3273_s28, %s3269_s26 }
  0x6d   :  { %p3276_p4 = por %p3275_p3, %p3274_p2 }
  0x6f   :  { %p3277_p5 = pnand %p3276_p4, %p3270_p1 }
  0x71   :  { %3280 = shalt.err (!%p3277_p5)
}
  0x72   :  { %63 = dma.hbm_to_vmem [thread:$0]  %s3936_s4, 16, %s61_s2, [#allocation6]  }
  0x73   :  { %s3389_s29 = smov [#allocation10]   ;;  %s3390_s14 = smov [#allocation13]  }
  0x74   :  { %s84_s0 = sshll.u32 %s3389_s29, 4  ;;  %s110_s23 = sshll.u32 %s3390_s14, 4  ;;  %s85_s0 = int_to_ptr.vmem [resolvable:$true] %s84_s0  ;;  %s111_s23 = int_to_ptr.vmem [resolvable:$true] %s110_s23 }
  0x75   :  { %s3281_s30 = scalar_lea.hbm %s3940_s8, 16 }
  0x76   :  { %p3282_p6 = scmp.ne.s32.totalorder %s3940_s8, %s3281_s30  ;;  %p3285_p7 = scmp.lt.u32.totalorder %s3281_s30, %s3940_s8 }
  0x78   :  { %p3287_p8 = pnand %p3285_p7, %p3282_p6 }
  0x7a   :  { %3290 = shalt.err (!%p3287_p8)
}
  0x7b   :  { %s3291_s4 = scalar_lea.vmem %s85_s0, 16  ;;  %s3295_s2 = scalar_lea.vmem %s85_s0, 32 }
  0x7c   :  { %p3292_p9 = scmp.ne.s32.totalorder %s85_s0, %s3291_s4  ;;  %p3296_p10 = scmp.lt.s32.totalorder %s85_s0, %s85_s0 }
  0x7d   :  { %p3297_p11 = scmp.lt.s32.totalorder %s3295_s2, %s3291_s4 }
  0x7f   :  { %p3298_p12 = por %p3297_p11, %p3296_p10 }
  0x81   :  { %p3299_p13 = pnand %p3298_p12, %p3292_p9 }
  0x83   :  { %3302 = shalt.err (!%p3299_p13)
}
  0x84   :  { %87 = dma.hbm_to_vmem [thread:$0]  %s3940_s8, 16, %s85_s0, [#allocation9]  }
  0x85   :  { %s3303_s22 = scalar_lea.hbm %s3944_s12, 16 }
  0x86   :  { %p3304_p0 = scmp.ne.s32.totalorder %s3944_s12, %s3303_s22  ;;  %p3307_p1 = scmp.lt.u32.totalorder %s3303_s22, %s3944_s12 }
  0x88   :  { %p3309_p2 = pnand %p3307_p1, %p3304_p0 }
  0x8a   :  { %3312 = shalt.err (!%p3309_p2)
}
  0x8b   :  { %s3313_s30 = scalar_lea.vmem %s111_s23, 16  ;;  %s3317_s18 = scalar_lea.vmem %s111_s23, 32 }
  0x8c   :  { %p3314_p3 = scmp.ne.s32.totalorder %s111_s23, %s3313_s30  ;;  %p3318_p4 = scmp.lt.s32.totalorder %s111_s23, %s111_s23 }
  0x8d   :  { %p3319_p5 = scmp.lt.s32.totalorder %s3317_s18, %s3313_s30 }
  0x8f   :  { %p3320_p6 = por %p3319_p5, %p3318_p4 }
  0x91   :  { %p3321_p7 = pnand %p3320_p6, %p3314_p3 }
  0x93   :  { %3324 = shalt.err (!%p3321_p7)
}
  0x94   :  { %113 = dma.hbm_to_vmem [thread:$0]  %s3944_s12, 16, %s111_s23, [#allocation12]  }
  0x95   :  { %s3391_s1 = smov [#allocation16]   ;;  %s3325_s2 = scalar_lea.hbm %s3948_s16, 128 }
  0x96   :  { %s134_s25 = sshll.u32 %s3391_s1, 4  ;;  %p3326_p8 = scmp.ne.s32.totalorder %s3948_s16, %s3325_s2  ;;  %s135_s25 = int_to_ptr.vmem [resolvable:$true] %s134_s25 }
  0x97   :  { %p3329_p9 = scmp.lt.u32.totalorder %s3325_s2, %s3948_s16 }
  0x99   :  { %p3331_p10 = pnand %p3329_p9, %p3326_p8 }
  0x9b   :  { %3334 = shalt.err (!%p3331_p10)
}
  0x9c   :  { %s3335_s22 = scalar_lea.vmem %s135_s25, 128  ;;  %p3340_p12 = scmp.lt.s32.totalorder %s135_s25, %s135_s25 }
  0x9d   :  { %p3336_p11 = scmp.ne.s32.totalorder %s135_s25, %s3335_s22  ;;  %p3341_p13 = scmp.lt.s32.totalorder %s3335_s22, %s3335_s22 }
  0x9f   :  { %p3342_p0 = por %p3341_p13, %p3340_p12 }
  0xa1   :  { %p3343_p1 = pnand %p3342_p0, %p3336_p11 }
  0xa3   :  { %3346 = shalt.err (!%p3343_p1)
}
  0xa4   :  { %137 = dma.hbm_to_vmem [thread:$0]  %s3948_s16, 128, %s135_s25, [#allocation15]  }
  0xa5   :  { %3369 = dma.done.wait [#allocation3], 256  }
  0xa6   :  { %3370 = vsyncadd [#allocation3], 4294967040 }
  0xa7   :  { %3371 = dma.done.wait [#allocation6], 32  }
  0xa8   :  { %3372 = vsyncadd [#allocation6], 4294967264 }
  0xa9   :  { %3373 = dma.done.wait [#allocation9], 32  }
  0xaa   :  { %3374 = vsyncadd [#allocation9], 4294967264 }
  0xab   :  { %3375 = dma.done.wait [#allocation12], 528  }
  0xac   :  { %3376 = vsyncadd [#allocation12], 4294966768 }
  0xad   :  { %3377 = dma.done.wait [#allocation15], 144  }
  0xae   :  { %3378 = vsyncadd [#allocation15], 4294967152  ;;  %vm178_vm0 = vcmask 261120   ;;  %s3955_s11 = sld [smem:[#allocation25_spill]]  ;;  %v3622_v5 = vld [vmem:[#allocation2] sm:$0xff]  ;;  %v261_v8 = vld [vmem:[%s3935_s3 + $0x8] sm:$0xff] }
  0xaf   :  { %2837 = vmatprep.mubr.msk.f32.mxu0 %vm178_vm0, %v3622_v5  ;;  %v260_v7 = vld [vmem:[%s3935_s3] sm:$0xff]  ;;  %v262_v10 = vld [vmem:[%s3935_s3 + $0x10] sm:$0xff]  ;;  %v263_v11 = vld [vmem:[%s3935_s3 + $0x18] sm:$0xff]  ;;  %v3392_v20 = vmov 0.0   ;;  %vm3393_vm1 = vmmov 0   ;;  %s3395_s21 = smov 120  }
  0xb0   :  { %v3036_v9 = vpack.c.bf16 %v261_v8, %v260_v7  ;;  %v3638_v12 = vld [vmem:[#allocation2 + $0x8] sm:$0xff]  ;;  %v3040_v13 = vpack.c.bf16 %v263_v11, %v262_v10  ;;  %v346_v14 = vld [vmem:[%s3937_s5] sm:$0xff]  ;;  %v348_v17 = vld [vmem:[%s3937_s5 + $0x10] sm:$0xff]  ;;  %2867 = vmatprep.subr.mxu1 %v3392_v20  ;;  %2869 = vmatprep.mubr.msk.f32.mxu1 %vm3393_vm1, %v3392_v20  ;;  %vm482_vm2 = vcmask 64512   ;;  %s3396_s30 = smov 104   ;;  %s3397_s0 = smov [#allocation17]  }
  0xb1   :  { %v347_v15 = vld [vmem:[%s3937_s5 + $0x8] sm:$0xff]  ;;  %v349_v18 = vld [vmem:[%s3937_s5 + $0x18] sm:$0xff]  ;;  %v2693_v21 = vld [vmem:[#allocation5] ss:$0 sm:$0xff]  ;;  %s3394_s5 = smov 112   ;;  %s2677_s1 = sshll.u32 %s3397_s0, 4  ;;  %s2678_s1 = int_to_ptr.vmem [resolvable:$true] %s2677_s1 }
  0xb2   :  { %v3044_v16 = vpack.c.bf16 %v347_v15, %v346_v14  ;;  %v3048_v19 = vpack.c.bf16 %v349_v18, %v348_v17  ;;  %v2696_v26 = vld [vmem:[#allocation7] ss:$0 sm:$0xff]  ;;  %v2699_v33 = vld [vmem:[#allocation8] ss:$0 sm:$0xff]  ;;  %s3347_s25 = scalar_lea.vmem %s2678_s1, 256  ;;  %p3352_p3 = scmp.lt.s32.totalorder %s2678_s1, %s2678_s1 }
  0xb3   :  { %p3348_p2 = scmp.ne.s32.totalorder %s2678_s1, %s3347_s25  ;;  %p3353_p4 = scmp.lt.s32.totalorder %s3347_s25, %s3347_s25 }
  0xb4   :  { %v167_v0 = vld [vmem:[%s3955_s11] sm:$0xff]  ;;  %v168_v1 = vld [vmem:[%s3955_s11 + $0x8] sm:$0xff]  ;;  %v169_v2 = vld [vmem:[%s3955_s11 + $0x10] sm:$0xff] }
  0xb5   :  { %v3028_v3 = vpack.c.bf16 %v168_v1, %v167_v0  ;;  %v170_v4 = vld [vmem:[%s3955_s11 + $0x18] sm:$0xff]  ;;  %p3354_p5 = por %p3353_p4, %p3352_p3 }
  0xb6   :  { %v3032_v6 = vpack.c.bf16 %v170_v4, %v169_v2 }
  0xb7   :  { %3029 = vmatprep.subr.bf16.mxu0 %v3028_v3  ;;  %p3355_p6 = pnand %p3354_p5, %p3348_p2 }
  0xb8   :  { %3031 = vmatpush3.bf16.msra.mxu0 %v3028_v3 }
  0xb9   :  { %3033 = vmatprep.subr.bf16.mxu0 %v3032_v6 }
  0xbc   :  { %3035 = vmatpush3.bf16.msra.mxu0 %v3032_v6 }
  0xbd   :  { %3037 = vmatprep.subr.bf16.mxu0 %v3036_v9 }
  0xbf   :  { %2838 = vmatmul.mubr.msk.f32.vlgmr.msra.gmra.mrb[0].mxu0 %vm178_vm0, %v3638_v12 }
  0xc0   :  { %3039 = vmatpush3.bf16.msra.mxu0 %v3036_v9  ;;  %2848 = vmatprep.mubr.msk.f32.mxu0 %vm178_vm0, %v3622_v5 }
  0xc1   :  { %3041 = vmatprep.subr.bf16.mxu0 %v3040_v13 }
  0xc4   :  { %3043 = vmatpush3.bf16.msra.mxu0 %v3040_v13 }
  0xc5   :  { %3045 = vmatprep.subr.bf16.mxu0 %v3044_v16 }
  0xc7   :  { %2849 = vmatmul.mubr.msk.f32.vlgmr.msra.gmra.mrb[2].mxu0 %vm178_vm0, %v3638_v12 }
  0xc8   :  { %3047 = vmatpush3.bf16.msra.mxu0 %v3044_v16  ;;  %2859 = vmatprep.mubr.msk.f32.mxu0 %vm178_vm0, %v3622_v5 }
  0xc9   :  { %3049 = vmatprep.subr.bf16.mxu0 %v3048_v19 }
  0xcc   :  { %3051 = vmatpush3.bf16.msra.mxu0 %v3048_v19 }
  0xcd   :  { %2862 = vmatprep.subr.mxu0 %v3392_v20 }
  0xcf   :  { %2860 = vmatmul.mubr.msk.f32.vlgmr.msra.gmra.mrb[4].mxu0 %vm178_vm0, %v3638_v12 }
  0xd0   :  { %2864 = vmatprep.mubr.msk.f32.mxu0 %vm3393_vm1, %v3392_v20 }
 0x192   :  { %v2839_v22 = vpop.f32.mrb[0].mxu0 }
 0x193   :  { %v251_v23 = vpop.f32.mrb[1].mxu0  ;;  %v257_v31 = vadd.f32 %v2839_v22, %v2693_v21 }
 0x194   :  { %v252_v24 = vadd.f32 %v2693_v21, %v251_v23 }
 0x195   :  { %v433_v32 = vmul.f32 0.125, %v257_v31 }
 0x196   :  { %v432_v25 = vmul.f32 0.125, %v252_v24 }
 0x198   :  { %437 = vrot.lane.b32.xlu0 %v432_v25, %s3394_s5  ;;  %435 = vrot.lane.b32.xlu1 %v432_v25, %s3395_s21 }
 0x19a   :  { %v2850_v27 = vpop.f32.mrb[2].mxu0 }
 0x19b   :  { %v337_v28 = vpop.f32.mrb[3].mxu0  ;;  %v343_v30 = vadd.f32 %v2850_v27, %v2696_v26 }
 0x19c   :  { %v338_v29 = vadd.f32 %v2696_v26, %v337_v28  ;;  %439 = vrot.lane.b32.xlu1 %v432_v25, %s3396_s30 }
 0x19e   :  { %2863 = vmatpush3.xpose.msk.msra.mxu0 %vm482_vm2, %v338_v29  ;;  %449 = vrot.lane.b32.xlu0 %v338_v29, %s3395_s21 }
 0x19f   :  { %2872 = vmatprep.subr.mxu0 %v3392_v20 }
 0x1a0   :  { %453 = vrot.lane.b32.xlu1 %v338_v29, %s3396_s30 }
 0x1a1   :  { %2865 = vmatmul.mubr.msk.f32.vlgmr.msra.gmra.mrb[6].mxu0 %vm482_vm2, %v432_v25 }
 0x1a2   :  { %451 = vrot.lane.b32.xlu0 %v338_v29, %s3394_s5  ;;  %2874 = vmatprep.mubr.msk.f32.mxu0 %vm3393_vm1, %v3392_v20  ;;  %v2861_v34 = vpop.f32.mrb[4].mxu0 }
 0x1a3   :  { %v3685_v35 = vadd.f32 %v2861_v34, %v2699_v33  ;;  %v423_v36 = vpop.f32.mrb[5].mxu0 }
 0x1a4   :  { %458 = vrot.lane.b32.xlu1 %v343_v30, %s3394_s5  ;;  %v424_v47 = vadd.f32 %v2699_v33, %v423_v36 }
 0x1a6   :  { %456 = vrot.lane.b32.xlu0 %v343_v30, %s3395_s21 }
 0x1a8   :  { %460 = vrot.lane.b32.xlu1 %v343_v30, %s3396_s30 }
 0x1aa   :  { %442 = vrot.lane.b32.xlu0 %v433_v32, %s3395_s21 }
 0x1ac   :  { %446 = vrot.lane.b32.xlu1 %v433_v32, %s3396_s30 }
 0x1ae   :  { %444 = vrot.lane.b32.xlu0 %v433_v32, %s3394_s5 }
 0x20a   :  { %v436_v37 = vpop.permute.xlu1 %435  ;;  %v438_v38 = vpop.permute.xlu0 %437 }
 0x20e   :  { %v440_v39 = vpop.permute.xlu1 %439 }
 0x210   :  { %v450_v40 = vpop.permute.xlu0 %449 }
 0x211   :  { %2868 = vmatpush3.xpose.msk.msra.mxu1 %vm482_vm2, %v450_v40 }
 0x212   :  { %v454_v41 = vpop.permute.xlu1 %453  ;;  %2877 = vmatprep.subr.mxu1 %v3392_v20 }
 0x214   :  { %v452_v42 = vpop.permute.xlu0 %451  ;;  %2870 = vmatmul.mubr.msk.f32.vlgmr.msra.gmra.mrb[0].mxu1 %vm482_vm2, %v436_v37 }
 0x215   :  { %2873 = vmatpush3.xpose.msk.msra.mxu0 %vm482_vm2, %v452_v42  ;;  %2878 = vmatpush3.xpose.msk.msra.mxu1 %vm482_vm2, %v454_v41 }
 0x216   :  { %v459_v43 = vpop.permute.xlu1 %458  ;;  %2879 = vmatprep.mubr.msk.f32.mxu1 %vm3393_vm1, %v3392_v20  ;;  %2882 = vmatprep.subr.mxu0 %v3392_v20 }
 0x217   :  { %2887 = vmatprep.subr.mxu1 %v3392_v20 }
 0x218   :  { %v457_v44 = vpop.permute.xlu0 %456  ;;  %2875 = vmatmul.mubr.msk.f32.vlgmr.msra.gmra.mrb[8].mxu0 %vm482_vm2, %v438_v38  ;;  %2880 = vmatmul.mubr.msk.f32.vlgmr.msra.gmra.mrb[2].mxu1 %vm482_vm2, %v440_v39 }
 0x219   :  { %2883 = vmatpush3.xpose.msk.msra.mxu0 %vm482_vm2, %v343_v30  ;;  %2888 = vmatpush3.xpose.msk.msra.mxu1 %vm482_vm2, %v457_v44 }
 0x21a   :  { %v461_v45 = vpop.permute.xlu1 %460  ;;  %2884 = vmatprep.mubr.msk.f32.mxu0 %vm3393_vm1, %v3392_v20  ;;  %2889 = vmatprep.mubr.msk.f32.mxu1 %vm3393_vm1, %v3392_v20 }
 0x21b   :  { %2892 = vmatprep.subr.mxu0 %v3392_v20  ;;  %2897 = vmatprep.subr.mxu1 %v3392_v20 }
 0x21c   :  { %v443_v46 = vpop.permute.xlu0 %442  ;;  %2885 = vmatmul.mubr.msk.f32.vlgmr.msra.gmra.mrb[10].mxu0 %vm482_vm2, %v433_v32 }
 0x21d   :  { %2890 = vmatmul.mubr.msk.f32.vlgmr.msra.gmra.mrb[4].mxu1 %vm482_vm2, %v443_v46  ;;  %2893 = vmatpush3.xpose.msk.msra.mxu0 %vm482_vm2, %v459_v43 }
 0x21e   :  { %2898 = vmatpush3.xpose.msk.msra.mxu1 %vm482_vm2, %v461_v45  ;;  %2894 = vmatprep.mubr.msk.f32.mxu0 %vm3393_vm1, %v3392_v20  ;;  %v447_v48 = vpop.permute.xlu1 %446 }
 0x21f   :  { %2899 = vmatprep.mubr.msk.f32.mxu1 %vm3393_vm1, %v3392_v20  ;;  %2902 = vmatprep.subr.mxu0 %v3392_v20 }
 0x220   :  { %v445_v49 = vpop.permute.xlu0 %444  ;;  %2907 = vmatprep.subr.mxu1 %v3392_v20 }
 0x221   :  { %2895 = vmatmul.mubr.msk.f32.vlgmr.msra.gmra.mrb[12].mxu0 %vm482_vm2, %v445_v49  ;;  %2900 = vmatmul.mubr.msk.f32.vlgmr.msra.gmra.mrb[6].mxu1 %vm482_vm2, %v447_v48 }
 0x222   :  { %2903 = vmatpush3.msra.mxu0 %v424_v47  ;;  %2904 = vmatprep.mubr.msk.f32.mxu0 %vm3393_vm1, %v3392_v20 }
 0x223   :  { %2912 = vmatprep.subr.mxu0 %v3392_v20  ;;  %2909 = vmatprep.mubr.msk.f32.mxu1 %vm3393_vm1, %v3392_v20 }
 0x274   :  { %v553_v50 = vpop.f32.mrb[6].mxu0 }
 0x275   :  { %v2866_v51 = vpop.f32.mrb[7].mxu0  ;;  %v1075_v52 = vsel %vm482_vm2, %v553_v50, -inf }
 0x276   :  { %1076 = vmax.xlane.f32.xlu0 %v1075_v52 }
 0x2e7   :  { %v627_v53 = vpop.f32.mrb[0].mxu1 }
 0x2e8   :  { %v2871_v54 = vpop.f32.mrb[1].mxu1  ;;  %v1078_v55 = vsel %vm482_vm2, %v627_v53, -inf }
 0x2e9   :  { %1079 = vmax.xlane.f32.xlu1 %v1078_v55 }
 0x2eb   :  { %v701_v56 = vpop.f32.mrb[8].mxu0  ;;  %v775_v57 = vpop.f32.mrb[2].mxu1 }
 0x2ec   :  { %v2876_v58 = vpop.f32.mrb[9].mxu0  ;;  %v2881_v59 = vpop.f32.mrb[3].mxu1  ;;  %v1081_v60 = vsel %vm482_vm2, %v701_v56, -inf  ;;  %v1084_v0 = vsel %vm482_vm2, %v775_v57, -inf }
 0x2ed   :  { %1082 = vmax.xlane.f32.xlu0 %v1081_v60 }
 0x2ef   :  { %v849_v61 = vpop.f32.mrb[10].mxu0 }
 0x2f0   :  { %v2886_v62 = vpop.f32.mrb[11].mxu0  ;;  %v923_v63 = vpop.f32.mrb[4].mxu1  ;;  %v1087_v1 = vsel %vm482_vm2, %v849_v61, -inf }
 0x2f1   :  { %v2891_v2 = vpop.f32.mrb[5].mxu1  ;;  %1085 = vmax.xlane.f32.xlu0 %v1084_v0  ;;  %1088 = vmax.xlane.f32.xlu1 %v1087_v1  ;;  %v1090_v6 = vsel %vm482_vm2, %v923_v63, -inf }
 0x2f4   :  { %v997_v3 = vpop.f32.mrb[12].mxu0  ;;  %v1071_v4 = vpop.f32.mrb[6].mxu1 }
 0x2f5   :  { %v2901_v7 = vpop.f32.mrb[7].mxu1  ;;  %1091 = vmax.xlane.f32.xlu0 %v1090_v6  ;;  %v2896_v8 = vpop.f32.mrb[13].mxu0  ;;  %v1093_v9 = vsel %vm482_vm2, %v997_v3, -inf  ;;  %v1096_v10 = vsel %vm482_vm2, %v1071_v4, -inf }
 0x2f6   :  { %1094 = vmax.xlane.f32.xlu1 %v1093_v9 }
 0x2f9   :  { %1097 = vmax.xlane.f32.xlu0 %v1096_v10 }
 0x303   :  { %v1077_v11 = vpop.xlane.xlu0 %1076 }
 0x304   :  { %v1099_v13 = vsub.f32 %v553_v50, %v1077_v11 }
 0x306   :  { %v1107_v14 = vmul.f32 1.442695, %v1099_v13 }
 0x307   :  { %463 = vrot.lane.b32.xlu1 %v424_v47, %s3395_s21 }
 0x308   :  { %3109 = vpow2.f32 %v1107_v14 }
 0x30b   :  { %469 = vrot.lane.b32.xlu1 %v424_v47, %s3396_s30 }
 0x30f   :  { %466 = vrot.lane.b32.xlu0 %v424_v47, %s3394_s5  ;;  %473 = vrot.lane.b32.xlu1 %v3685_v35, %s3395_s21 }
 0x312   :  { %v3110_v15 = vpop.eup %3109 }
 0x313   :  { %v1123_v16 = vsel %vm482_vm2, %v3110_v15, 0.0 }
 0x333   :  { %1124 = vadd.xlane.f32.xlu1 %v1123_v16 }
 0x376   :  { %v1080_v17 = vpop.xlane.xlu1 %1079 }
 0x377   :  { %v1100_v18 = vsub.f32 %v627_v53, %v1080_v17 }
 0x379   :  { %v1109_v19 = vmul.f32 1.442695, %v1100_v18  ;;  %v1747_v18 = vld [vmem:[%s3939_s7] sm:$0xff] }
 0x37a   :  { %v1083_v21 = vpop.xlane.xlu0 %1082 }
 0x37b   :  { %3111 = vpow2.f32 %v1109_v19  ;;  %v1101_v22 = vsub.f32 %v701_v56, %v1083_v21 }
 0x37d   :  { %v1111_v23 = vmul.f32 1.442695, %v1101_v22 }
 0x37e   :  { %v1086_v24 = vpop.xlane.xlu0 %1085  ;;  %v1089_v25 = vpop.xlane.xlu1 %1088 }
 0x37f   :  { %3113 = vpow2.f32 %v1111_v23  ;;  %v1102_v26 = vsub.f32 %v775_v57, %v1086_v24  ;;  %v1103_v27 = vsub.f32 %v849_v61, %v1089_v25  ;;  %v1748_v23 = vld [vmem:[%s3939_s7 + $0x8] sm:$0xff]  ;;  %v1749_v24 = vld [vmem:[%s3939_s7 + $0x10] sm:$0xff] }
 0x381   :  { %v1113_v28 = vmul.f32 1.442695, %v1102_v26  ;;  %v1115_v29 = vmul.f32 1.442695, %v1103_v27  ;;  %v1750_v27 = vld [vmem:[%s3939_s7 + $0x18] sm:$0xff] }
 0x382   :  { %v1092_v30 = vpop.xlane.xlu0 %1091 }
 0x383   :  { %3115 = vpow2.f32 %v1113_v28  ;;  %v1104_v31 = vsub.f32 %v923_v63, %v1092_v30  ;;  %v1095_v32 = vpop.xlane.xlu1 %1094  ;;  %v1751_v30 = vld [vmem:[%s3939_s7 + $0x20] sm:$0xff] }
 0x384   :  { %3117 = vpow2.f32 %v1115_v29  ;;  %v1105_v33 = vsub.f32 %v997_v3, %v1095_v32 }
 0x385   :  { %v3112_v34 = vpop.eup %3111  ;;  %v1117_v36 = vmul.f32 1.442695, %v1104_v31 }
 0x386   :  { %v1119_v37 = vmul.f32 1.442695, %v1105_v33  ;;  %v1098_v38 = vpop.xlane.xlu0 %1097  ;;  %v1126_v39 = vsel %vm482_vm2, %v3112_v34, 0.0  ;;  %v1752_v33 = vld [vmem:[%s3939_s7 + $0x28] sm:$0xff] }
 0x387   :  { %3119 = vpow2.f32 %v1117_v36  ;;  %v1106_v40 = vsub.f32 %v1071_v4, %v1098_v38  ;;  %1127 = vadd.xlane.f32.xlu0 %v1126_v39  ;;  %v464_v41 = vpop.permute.xlu1 %463  ;;  %v1753_v36 = vld [vmem:[%s3939_s7 + $0x30] sm:$0xff] }
 0x388   :  { %3121 = vpow2.f32 %v1119_v37  ;;  %2908 = vmatpush3.msra.mxu1 %v464_v41 }
 0x389   :  { %v3114_v42 = vpop.eup %3113  ;;  %v1121_v43 = vmul.f32 1.442695, %v1106_v40  ;;  %2917 = vmatprep.subr.mxu1 %v3392_v20  ;;  %v1754_v40 = vld [vmem:[%s3939_s7 + $0x38] sm:$0xff] }
 0x38a   :  { %v1129_v44 = vsel %vm482_vm2, %v3114_v42, 0.0  ;;  %v467_v60 = vpop.permute.xlu0 %466 }
 0x38b   :  { %3123 = vpow2.f32 %v1121_v43  ;;  %1130 = vadd.xlane.f32.xlu1 %v1129_v44  ;;  %v470_v55 = vpop.permute.xlu1 %469 }
 0x38d   :  { %v3116_v45 = vpop.eup %3115 }
 0x38e   :  { %v3118_v46 = vpop.eup %3117  ;;  %v1132_v47 = vsel %vm482_vm2, %v3116_v45, 0.0 }
 0x38f   :  { %1133 = vadd.xlane.f32.xlu0 %v1132_v47  ;;  %v1135_v48 = vsel %vm482_vm2, %v3118_v46, 0.0  ;;  %v474_v56 = vpop.permute.xlu1 %473 }
 0x390   :  { %1136 = vadd.xlane.f32.xlu1 %v1135_v48 }
 0x391   :  { %v3120_v49 = vpop.eup %3119 }
 0x392   :  { %v3122_v50 = vpop.eup %3121  ;;  %v1138_v51 = vsel %vm482_vm2, %v3120_v49, 0.0 }
 0x393   :  { %1139 = vadd.xlane.f32.xlu0 %v1138_v51  ;;  %v1141_v52 = vsel %vm482_vm2, %v3122_v50, 0.0 }
 0x394   :  { %1142 = vadd.xlane.f32.xlu1 %v1141_v52 }
 0x395   :  { %v3744_v53 = vpop.eup %3123 }
 0x396   :  { %v1144_v54 = vsel %vm482_vm2, %v3744_v53, 0.0 }
 0x397   :  { %1145 = vadd.xlane.f32.xlu0 %v1144_v54 }
 0x3a5   :  { %479 = vrot.lane.b32.xlu1 %v3685_v35, %s3396_s30 }
 0x3ad   :  { %476 = vrot.lane.b32.xlu0 %v3685_v35, %s3394_s5 }
 0x3c0   :  { %v1125_v57 = vpop.xlane.xlu1 %1124 }
 0x3c1   :  { %3125 = vrcp.f32 %v1125_v57 }
 0x3cb   :  { %v3126_v58 = vpop.eup %3125 }
 0x3cc   :  { %v1155_v59 = vmul.f32 %v3126_v58, %v3110_v15 }
 0x3ce   :  { %2905 = vmatmul.mubr.msk.f32.vlgmr.msra.gmra.mrb[14].mxu0 %vm482_vm2, %v1155_v59 }
 0x3cf   :  { %2913 = vmatpush3.msra.mxu0 %v467_v60  ;;  %2914 = vmatprep.mubr.msk.f32.mxu0 %vm3393_vm1, %v3392_v20 }
 0x3d0   :  { %2922 = vmatprep.subr.mxu0 %v3392_v20 }
 0x414   :  { %v1128_v61 = vpop.xlane.xlu0 %1127 }
 0x415   :  { %3127 = vrcp.f32 %v1128_v61 }
 0x418   :  { %v1131_v62 = vpop.xlane.xlu1 %1130 }
 0x419   :  { %3129 = vrcp.f32 %v1131_v62 }
 0x41c   :  { %v1134_v63 = vpop.xlane.xlu0 %1133 }
 0x41d   :  { %3131 = vrcp.f32 %v1134_v63  ;;  %v1137_v0 = vpop.xlane.xlu1 %1136 }
 0x41e   :  { %3133 = vrcp.f32 %v1137_v0 }
 0x41f   :  { %v3128_v1 = vpop.eup %3127 }
 0x420   :  { %v1156_v2 = vmul.f32 %v3128_v1, %v3112_v34  ;;  %v1140_v3 = vpop.xlane.xlu0 %1139 }
 0x421   :  { %3135 = vrcp.f32 %v1140_v3  ;;  %v1143_v4 = vpop.xlane.xlu1 %1142 }
 0x422   :  { %3137 = vrcp.f32 %v1143_v4  ;;  %2910 = vmatmul.mubr.msk.f32.vlgmr.msra.gmra.mrb[8].mxu1 %vm482_vm2, %v1156_v2 }
 0x423   :  { %v3130_v6 = vpop.eup %3129  ;;  %2918 = vmatpush3.msra.mxu1 %v470_v55  ;;  %2919 = vmatprep.mubr.msk.f32.mxu1 %vm3393_vm1, %v3392_v20 }
 0x424   :  { %v1157_v7 = vmul.f32 %v3130_v6, %v3114_v42  ;;  %v1146_v8 = vpop.xlane.xlu0 %1145  ;;  %2927 = vmatprep.subr.mxu1 %v3392_v20 }
 0x425   :  { %3139 = vrcp.f32 %v1146_v8  ;;  %v480_v19 = vpop.permute.xlu1 %479 }
 0x426   :  { %2915 = vmatmul.mubr.msk.f32.vlgmr.msra.gmra.mrb[16].mxu0 %vm482_vm2, %v1157_v7 }
 0x427   :  { %v3132_v9 = vpop.eup %3131  ;;  %2923 = vmatpush3.msra.mxu0 %v3685_v35  ;;  %2924 = vmatprep.mubr.msk.f32.mxu0 %vm3393_vm1, %v3392_v20 }
 0x428   :  { %v3134_v10 = vpop.eup %3133  ;;  %v1158_v11 = vmul.f32 %v3132_v9, %v3116_v45  ;;  %2932 = vmatprep.subr.mxu0 %v3392_v20  ;;  %v477_v14 = vpop.permute.xlu0 %476 }
 0x429   :  { %v1159_v13 = vmul.f32 %v3134_v10, %v3118_v46 }
 0x42a   :  { %2920 = vmatmul.mubr.msk.f32.vlgmr.msra.gmra.mrb[10].mxu1 %vm482_vm2, %v1158_v11 }
 0x42b   :  { %v3136_v15 = vpop.eup %3135  ;;  %2925 = vmatmul.mubr.msk.f32.vlgmr.msra.gmra.mrb[18].mxu0 %vm482_vm2, %v1159_v13  ;;  %2928 = vmatpush3.msra.mxu1 %v474_v56  ;;  %v2734_v56 = vld [vmem:[#allocation10] ss:$0 sm:$0xff] }
 0x42c   :  { %v3138_v16 = vpop.eup %3137  ;;  %v1160_v17 = vmul.f32 %v3136_v15, %v3120_v49  ;;  %2933 = vmatpush3.msra.mxu0 %v477_v14  ;;  %2929 = vmatprep.mubr.msk.f32.mxu1 %vm3393_vm1, %v3392_v20 }
 0x42d   :  { %v1161_v35 = vmul.f32 %v3138_v16, %v3122_v50  ;;  %2937 = vmatprep.subr.mxu1 %v3392_v20  ;;  %2934 = vmatprep.mubr.msk.f32.mxu0 %vm3393_vm1, %v3392_v20  ;;  %v2416_v16 = vld [vmem:[#allocation11] sm:$0xff] }
 0x42e   :  { %2930 = vmatmul.mubr.msk.f32.vlgmr.msra.gmra.mrb[12].mxu1 %vm482_vm2, %v1160_v17  ;;  %2942 = vmatprep.subr.mxu0 %v3392_v20  ;;  %v2417_v17 = vld [vmem:[#allocation11 + $0x8] sm:$0xff] }
 0x42f   :  { %v3140_v21 = vpop.eup %3139  ;;  %2938 = vmatpush3.msra.mxu1 %v480_v19  ;;  %2935 = vmatmul.mubr.msk.f32.vlgmr.msra.gmra.mrb[20].mxu0 %vm482_vm2, %v1161_v35  ;;  %v3052_v35 = vpack.c.bf16 %v2417_v17, %v2416_v16  ;;  %v2419_v19 = vld [vmem:[#allocation11 + $0x18] sm:$0xff] }
 0x430   :  { %v1162_v22 = vmul.f32 %v3140_v21, %v3744_v53  ;;  %2939 = vmatprep.mubr.msk.f32.mxu1 %vm3393_vm1, %v3392_v20  ;;  %2943 = vmatpush3.msra.mxu0 %v1747_v18  ;;  %v2418_v18 = vld [vmem:[#allocation11 + $0x10] sm:$0xff] }
 0x431   :  { %2944 = vmatprep.mubr.msk.f32.mxu0 %vm3393_vm1, %v3392_v20  ;;  %2947 = vmatprep.subr.mxu1 %v3392_v20  ;;  %v3056_v21 = vpack.c.bf16 %v2419_v19, %v2418_v18 }
 0x432   :  { %2940 = vmatmul.mubr.msk.f32.vlgmr.msra.gmra.mrb[14].mxu1 %vm482_vm2, %v1162_v22  ;;  %2952 = vmatprep.subr.mxu0 %v3392_v20  ;;  %v2511_v22 = vld [vmem:[%s3945_s13 + $0x8] sm:$0xff] }
 0x433   :  { %2949 = vmatprep.mubr.msk.f32.mxu1 %vm3393_vm1, %v3392_v20  ;;  %2948 = vmatpush3.msra.mxu1 %v1748_v23  ;;  %v2512_v23 = vld [vmem:[%s3945_s13 + $0x10] sm:$0xff] }
 0x434   :  { %2957 = vmatprep.subr.mxu1 %v3392_v20 }
 0x4a1   :  { %v1232_v25 = vpop.f32.mrb[14].mxu0 }
 0x4a2   :  { %v2906_v26 = vpop.f32.mrb[15].mxu0  ;;  %2945 = vmatmul.mubr.msk.f32.vlgmr.msra.gmra.mrb[22].mxu0 %vm482_vm2, %v1232_v25  ;;  %v2513_v25 = vld [vmem:[%s3945_s13 + $0x18] sm:$0xff] }
 0x4a3   :  { %2953 = vmatpush3.msra.mxu0 %v1749_v24  ;;  %2954 = vmatprep.mubr.msk.f32.mxu0 %vm3393_vm1, %v3392_v20  ;;  %v3064_v26 = vpack.c.bf16 %v2513_v25, %v2512_v23 }
 0x4a4   :  { %2962 = vmatprep.subr.mxu0 %v3392_v20 }
 0x4f5   :  { %v1305_v28 = vpop.f32.mrb[8].mxu1 }
 0x4f6   :  { %v2911_v29 = vpop.f32.mrb[9].mxu1  ;;  %2950 = vmatmul.mubr.msk.f32.vlgmr.msra.gmra.mrb[16].mxu1 %vm482_vm2, %v1305_v28  ;;  %v2515_v28 = vld [vmem:[%s3945_s13 + $0x28] sm:$0xff] }
 0x4f7   :  { %2958 = vmatpush3.msra.mxu1 %v1750_v27  ;;  %2959 = vmatprep.mubr.msk.f32.mxu1 %vm3393_vm1, %v3392_v20  ;;  %v2514_v27 = vld [vmem:[%s3945_s13 + $0x20] sm:$0xff] }
 0x4f8   :  { %2967 = vmatprep.subr.mxu1 %v3392_v20  ;;  %v3068_v29 = vpack.c.bf16 %v2515_v28, %v2514_v27 }
 0x4f9   :  { %v1378_v31 = vpop.f32.mrb[16].mxu0 }
 0x4fa   :  { %v2916_v32 = vpop.f32.mrb[17].mxu0  ;;  %2955 = vmatmul.mubr.msk.f32.vlgmr.msra.gmra.mrb[24].mxu0 %vm482_vm2, %v1378_v31  ;;  %v2517_v31 = vld [vmem:[%s3945_s13 + $0x38] sm:$0xff] }
 0x4fb   :  { %2963 = vmatpush3.msra.mxu0 %v1751_v30  ;;  %2964 = vmatprep.mubr.msk.f32.mxu0 %vm3393_vm1, %v3392_v20  ;;  %v2516_v30 = vld [vmem:[%s3945_s13 + $0x30] sm:$0xff] }
 0x4fc   :  { %2972 = vmatprep.subr.mxu0 %v3392_v20  ;;  %v3072_v32 = vpack.c.bf16 %v2517_v31, %v2516_v30  ;;  %v2525_v30 = vld [vmem:[%s3945_s13 + $0x78] sm:$0xff] }
 0x4fd   :  { %v1451_v34 = vpop.f32.mrb[10].mxu1 }
 0x4fe   :  { %v1524_v37 = vpop.f32.mrb[18].mxu0  ;;  %v2921_v38 = vpop.f32.mrb[11].mxu1  ;;  %2960 = vmatmul.mubr.msk.f32.vlgmr.msra.gmra.mrb[18].mxu1 %vm482_vm2, %v1451_v34  ;;  %v2519_v34 = vld [vmem:[%s3945_s13 + $0x48] sm:$0xff] }
 0x4ff   :  { %v2926_v39 = vpop.f32.mrb[19].mxu0  ;;  %2965 = vmatmul.mubr.msk.f32.vlgmr.msra.gmra.mrb[26].mxu0 %vm482_vm2, %v1524_v37  ;;  %2968 = vmatpush3.msra.mxu1 %v1752_v33  ;;  %v2518_v33 = vld [vmem:[%s3945_s13 + $0x40] sm:$0xff]  ;;  %v2520_v37 = vld [vmem:[%s3945_s13 + $0x50] sm:$0xff]  ;;  %v2521_v38 = vld [vmem:[%s3945_s13 + $0x58] sm:$0xff] }
 0x500   :  { %2969 = vmatprep.mubr.msk.f32.mxu1 %vm3393_vm1, %v3392_v20  ;;  %2973 = vmatpush3.msra.mxu0 %v1753_v36  ;;  %v3076_v36 = vpack.c.bf16 %v2519_v34, %v2518_v33  ;;  %v3080_v39 = vpack.c.bf16 %v2521_v38, %v2520_v37 }
 0x501   :  { %v1597_v41 = vpop.f32.mrb[12].mxu1  ;;  %2974 = vmatprep.mubr.msk.f32.mxu0 %vm3393_vm1, %v3392_v20  ;;  %2977 = vmatprep.subr.mxu1 %v3392_v20 }
 0x502   :  { %v2931_v42 = vpop.f32.mrb[13].mxu1  ;;  %v1670_v43 = vpop.f32.mrb[20].mxu0  ;;  %2970 = vmatmul.mubr.msk.f32.vlgmr.msra.gmra.mrb[20].mxu1 %vm482_vm2, %v1597_v41  ;;  %3053 = vmatprep.subr.bf16.mxu0 %v3052_v35  ;;  %v2523_v41 = vld [vmem:[%s3945_s13 + $0x68] sm:$0xff] }
 0x503   :  { %v2936_v44 = vpop.f32.mrb[21].mxu0  ;;  %2975 = vmatmul.mubr.msk.f32.vlgmr.msra.gmra.mrb[28].mxu0 %vm482_vm2, %v1670_v43  ;;  %2978 = vmatpush3.msra.mxu1 %v1754_v40  ;;  %v2522_v40 = vld [vmem:[%s3945_s13 + $0x60] sm:$0xff] }
 0x504   :  { %2979 = vmatprep.mubr.msk.f32.mxu1 %vm3393_vm1, %v3392_v20  ;;  %3055 = vmatpush3.bf16.msra.mxu0 %v3052_v35  ;;  %v3084_v42 = vpack.c.bf16 %v2523_v41, %v2522_v40 }
 0x505   :  { %v1743_v45 = vpop.f32.mrb[14].mxu1  ;;  %3057 = vmatprep.subr.bf16.mxu0 %v3056_v21 }
 0x506   :  { %v2941_v46 = vpop.f32.mrb[15].mxu1  ;;  %2980 = vmatmul.mubr.msk.f32.vlgmr.msra.gmra.mrb[22].mxu1 %vm482_vm2, %v1743_v45 }
 0x508   :  { %3059 = vmatpush3.bf16.msra.mxu0 %v3056_v21  ;;  %v2354_v21 = vld [vmem:[%s3941_s9] sm:$0xff] }
 0x575   :  { %v1824_v47 = vpop.f32.mrb[22].mxu0 }
 0x576   :  { %v2946_v48 = vpop.f32.mrb[23].mxu0 }
 0x5c9   :  { %v1897_v49 = vpop.f32.mrb[16].mxu1 }
 0x5ca   :  { %v2339_v50 = vadd.f32 %v1897_v49, %v1824_v47  ;;  %v2951_v51 = vpop.f32.mrb[17].mxu1 }
 0x5cd   :  { %v1970_v52 = vpop.f32.mrb[24].mxu0 }
 0x5ce   :  { %v2341_v53 = vadd.f32 %v2339_v50, %v1970_v52  ;;  %v2956_v54 = vpop.f32.mrb[25].mxu0 }
 0x5d1   :  { %v2043_v55 = vpop.f32.mrb[18].mxu1 }
 0x5d2   :  { %v2343_v57 = vadd.f32 %v2341_v53, %v2043_v55  ;;  %v2116_v58 = vpop.f32.mrb[26].mxu0  ;;  %v2961_v59 = vpop.f32.mrb[19].mxu1 }
 0x5d3   :  { %v2966_v60 = vpop.f32.mrb[27].mxu0 }
 0x5d4   :  { %v2352_v61 = vadd.f32 %v2734_v56, %v2343_v57 }
 0x5d5   :  { %v2189_v20 = vpop.f32.mrb[20].mxu1 }
 0x5d6   :  { %v3835_v62 = vadd.f32 %v2352_v61, %v3622_v5  ;;  %v2340_v63 = vadd.f32 %v2189_v20, %v2116_v58  ;;  %v2971_v0 = vpop.f32.mrb[21].mxu1  ;;  %v2262_v1 = vpop.f32.mrb[28].mxu0 }
 0x5d7   :  { %v2976_v2 = vpop.f32.mrb[29].mxu0 }
 0x5d8   :  { %v2342_v3 = vadd.f32 %v2340_v63, %v2262_v1  ;;  %v2358_v4 = vsel %vm178_vm0, %v3835_v62, 0.0  ;;  %v2378_v6 = vmul.f32 %v3835_v62, %v3835_v62 }
 0x5d9   :  { %v2335_v7 = vpop.f32.mrb[22].mxu1  ;;  %2359 = vadd.xlane.f32.xlu0 %v2358_v4 }
 0x5da   :  { %v2344_v8 = vadd.f32 %v2342_v3, %v2335_v7  ;;  %v2981_v9 = vpop.f32.mrb[23].mxu1  ;;  %v2380_v11 = vsel %vm178_vm0, %v2378_v6, 0.0 }
 0x5dc   :  { %v2353_v10 = vadd.f32 %v2734_v56, %v2344_v8 }
 0x5dd   :  { %2381 = vadd.xlane.f32.xlu0 %v2380_v11 }
 0x5de   :  { %v3843_v5 = vadd.f32 %v2353_v10, %v3638_v12  ;;  %v2510_v12 = vld [vmem:[%s3945_s13] sm:$0xff] }
 0x5df   :  { %v3060_v24 = vpack.c.bf16 %v2511_v22, %v2510_v12  ;;  %v2355_v22 = vld [vmem:[%s3942_s10] sm:$0xff] }
 0x5e0   :  { %v2361_v13 = vsel %vm178_vm0, %v3843_v5, 0.0  ;;  %v2379_v14 = vmul.f32 %v3843_v5, %v3843_v5 }
 0x5e1   :  { %2362 = vadd.xlane.f32.xlu1 %v2361_v13  ;;  %3061 = vmatprep.subr.bf16.mxu1 %v3060_v24 }
 0x5e2   :  { %v2383_v15 = vsel %vm178_vm0, %v2379_v14, 0.0  ;;  %3063 = vmatpush3.bf16.msra.mxu1 %v3060_v24 }
 0x5e3   :  { %2384 = vadd.xlane.f32.xlu0 %v2383_v15  ;;  %3065 = vmatprep.subr.bf16.mxu1 %v3064_v26 }
 0x5e6   :  { %3067 = vmatpush3.bf16.msra.mxu1 %v3064_v26 }
 0x5e7   :  { %3069 = vmatprep.subr.bf16.mxu1 %v3068_v29 }
 0x5ea   :  { %3071 = vmatpush3.bf16.msra.mxu1 %v3068_v29  ;;  %v2524_v29 = vld [vmem:[%s3945_s13 + $0x70] sm:$0xff] }
 0x5eb   :  { %3073 = vmatprep.subr.bf16.mxu1 %v3072_v32  ;;  %v3088_v31 = vpack.c.bf16 %v2525_v30, %v2524_v29  ;;  %v2608_v29 = vld [vmem:[%s3947_s15] sm:$0xff] }
 0x5ee   :  { %3075 = vmatpush3.bf16.msra.mxu1 %v3072_v32 }
 0x5ef   :  { %3077 = vmatprep.subr.bf16.mxu1 %v3076_v36 }
 0x5f2   :  { %3079 = vmatpush3.bf16.msra.mxu1 %v3076_v36 }
 0x5f3   :  { %3081 = vmatprep.subr.bf16.mxu1 %v3080_v39 }
 0x5f6   :  { %3083 = vmatpush3.bf16.msra.mxu1 %v3080_v39  ;;  %v2738_v39 = vld [vmem:[#allocation14] ss:$0 sm:$0xff] }
 0x5f7   :  { %3085 = vmatprep.subr.bf16.mxu1 %v3084_v42 }
 0x5fa   :  { %3087 = vmatpush3.bf16.msra.mxu1 %v3084_v42 }
 0x5fb   :  { %3089 = vmatprep.subr.bf16.mxu1 %v3088_v31 }
 0x5fe   :  { %3091 = vmatpush3.bf16.msra.mxu1 %v3088_v31 }
 0x666   :  { %v2360_v43 = vpop.xlane.xlu0 %2359 }
 0x667   :  { %v2364_v44 = vrot.slane %v2360_v43, 4 }
 0x669   :  { %v2365_v45 = vadd.f32 %v2364_v44, %v2360_v43 }
 0x66a   :  { %v2382_v46 = vpop.xlane.xlu0 %2381 }
 0x66b   :  { %v2366_v47 = vrot.slane %v2365_v45, 2  ;;  %v2386_v48 = vrot.slane %v2382_v46, 4 }
 0x66d   :  { %v2367_v49 = vadd.f32 %v2366_v47, %v2365_v45  ;;  %v2387_v50 = vadd.f32 %v2386_v48, %v2382_v46 }
 0x66e   :  { %v2363_v51 = vpop.xlane.xlu1 %2362 }
 0x66f   :  { %v2368_v52 = vrot.slane %v2367_v49, 1  ;;  %v2388_v53 = vrot.slane %v2387_v50, 2  ;;  %v2370_v54 = vrot.slane %v2363_v51, 4 }
 0x670   :  { %v2385_v55 = vpop.xlane.xlu0 %2384 }
 0x671   :  { %v2369_v56 = vadd.f32 %v2368_v52, %v2367_v49  ;;  %v2389_v57 = vadd.f32 %v2388_v53, %v2387_v50  ;;  %v2371_v58 = vadd.f32 %v2370_v54, %v2363_v51  ;;  %v2392_v59 = vrot.slane %v2385_v55, 4 }
 0x673   :  { %v2376_v60 = vmul.f32 0.00390625, %v2369_v56  ;;  %v2390_v61 = vrot.slane %v2389_v57, 1  ;;  %v2372_v20 = vrot.slane %v2371_v58, 2  ;;  %v2393_v63 = vadd.f32 %v2392_v59, %v2385_v55 }
 0x675   :  { %v2391_v0 = vadd.f32 %v2390_v61, %v2389_v57  ;;  %v2373_v1 = vadd.f32 %v2372_v20, %v2371_v58  ;;  %v2394_v2 = vrot.slane %v2393_v63, 2  ;;  %v2400_v3 = vmul.f32 %v2376_v60, %v2376_v60 }
 0x676   :  { %v2408_v18 = vsub.f32 %v3835_v62, %v2376_v60 }
 0x677   :  { %v2398_v4 = vmul.f32 0.00390625, %v2391_v0  ;;  %v2374_v6 = vrot.slane %v2373_v1, 1  ;;  %v2395_v7 = vadd.f32 %v2394_v2, %v2393_v63 }
 0x679   :  { %v2402_v8 = vsub.f32 %v2398_v4, %v2400_v3  ;;  %v2375_v9 = vadd.f32 %v2374_v6, %v2373_v1  ;;  %v2396_v10 = vrot.slane %v2395_v7, 1 }
 0x67b   :  { %v2404_v11 = vadd.f32 1e-05, %v2402_v8  ;;  %v2377_v13 = vmul.f32 0.00390625, %v2375_v9  ;;  %v2397_v14 = vadd.f32 %v2396_v10, %v2395_v7 }
 0x67d   :  { %3141 = vrsqrt.f32 %v2404_v11  ;;  %v2401_v15 = vmul.f32 %v2377_v13, %v2377_v13  ;;  %v2399_v16 = vmul.f32 0.00390625, %v2397_v14  ;;  %v2409_v25 = vsub.f32 %v3843_v5, %v2377_v13  ;;  %v2735_v5 = vld [vmem:[#allocation13] ss:$0 sm:$0xff] }
 0x67f   :  { %v2403_v17 = vsub.f32 %v2399_v16, %v2401_v15 }
 0x681   :  { %v2405_v35 = vadd.f32 1e-05, %v2403_v17 }
 0x683   :  { %3143 = vrsqrt.f32 %v2405_v35 }
 0x687   :  { %v3142_v19 = vpop.eup %3141 }
 0x688   :  { %v2410_v12 = vmul.f32 %v3142_v19, %v2408_v18 }
 0x68a   :  { %v2412_v23 = vmul.f32 %v2410_v12, %v2354_v21 }
 0x68c   :  { %v2414_v24 = vadd.f32 %v2412_v23, %v2355_v22 }
 0x68d   :  { %v3144_v26 = vpop.eup %3143 }
 0x68e   :  { %2990 = vmatprep.mubr.msk.f32.mxu0 %vm178_vm0, %v2414_v24  ;;  %v2411_v27 = vmul.f32 %v3144_v26, %v2409_v25 }
 0x690   :  { %v2413_v28 = vmul.f32 %v2411_v27, %v2354_v21 }
 0x692   :  { %v2415_v62 = vadd.f32 %v2413_v28, %v2355_v22 }
 0x694   :  { %2991 = vmatmul.mubr.msk.f32.vlgmr.msra.gmra.mrb[30].mxu0 %vm178_vm0, %v2415_v62 }
 0x767   :  { %v2992_v32 = vpop.f32.mrb[30].mxu0 }
 0x768   :  { %v2505_v33 = vadd.f32 %v2992_v32, %v2735_v5  ;;  %v2499_v34 = vpop.f32.mrb[31].mxu0 }
 0x769   :  { %v2500_v36 = vadd.f32 %v2735_v5, %v2499_v34  ;;  %v2609_v5 = vld [vmem:[#allocation16] sm:$0xff] }
 0x76a   :  { %v2509_v38 = vmax.f32 %v2505_v33, 0.0 }
 0x76b   :  { %v2508_v37 = vmax.f32 %v2500_v36, 0.0 }
 0x76d   :  { %3025 = vmatprep.mubr.f32.mxu1 %v2508_v37 }
 0x76e   :  { %3026 = vmatmul.mubr.f32.vlgmr.msra.gmra.mrb[24].mxu1 %v2509_v38 }
 0x841   :  { %v3027_v40 = vpop.f32.mrb[24].mxu1 }
 0x842   :  { %v2605_v41 = vadd.f32 %v3027_v40, %v2738_v39  ;;  %v2599_v42 = vpop.f32.mrb[25].mxu1 }
 0x843   :  { %v2600_v43 = vadd.f32 %v2738_v39, %v2599_v42 }
 0x844   :  { %v2611_v44 = vadd.f32 %v2605_v41, %v2415_v62 }
 0x845   :  { %v2610_v45 = vadd.f32 %v2600_v43, %v2414_v24 }
 0x846   :  { %v2615_v46 = vsel %vm178_vm0, %v2611_v44, 0.0  ;;  %v2633_v47 = vmul.f32 %v2611_v44, %v2611_v44 }
 0x847   :  { %2616 = vadd.xlane.f32.xlu0 %v2615_v46  ;;  %v2612_v48 = vsel %vm178_vm0, %v2610_v45, 0.0  ;;  %v2632_v49 = vmul.f32 %v2610_v45, %v2610_v45 }
 0x848   :  { %2613 = vadd.xlane.f32.xlu1 %v2612_v48  ;;  %v2637_v50 = vsel %vm178_vm0, %v2633_v47, 0.0 }
 0x849   :  { %v2634_v51 = vsel %vm178_vm0, %v2632_v49, 0.0 }
 0x84b   :  { %2638 = vadd.xlane.f32.xlu0 %v2637_v50 }
 0x84c   :  { %2635 = vadd.xlane.f32.xlu1 %v2634_v51 }
 0x8d4   :  { %v2617_v52 = vpop.xlane.xlu0 %2616 }
 0x8d5   :  { %v2624_v53 = vrot.slane %v2617_v52, 4  ;;  %v2614_v54 = vpop.xlane.xlu1 %2613 }
 0x8d6   :  { %v2618_v55 = vrot.slane %v2614_v54, 4 }
 0x8d7   :  { %v2625_v56 = vadd.f32 %v2624_v53, %v2617_v52 }
 0x8d8   :  { %v2619_v57 = vadd.f32 %v2618_v55, %v2614_v54  ;;  %v2639_v58 = vpop.xlane.xlu0 %2638 }
 0x8d9   :  { %v2626_v59 = vrot.slane %v2625_v56, 2  ;;  %v2646_v60 = vrot.slane %v2639_v58, 4  ;;  %v2636_v61 = vpop.xlane.xlu1 %2635 }
 0x8da   :  { %v2620_v20 = vrot.slane %v2619_v57, 2  ;;  %v2640_v63 = vrot.slane %v2636_v61, 4 }
 0x8db   :  { %v2627_v0 = vadd.f32 %v2626_v59, %v2625_v56  ;;  %v2647_v1 = vadd.f32 %v2646_v60, %v2639_v58 }
 0x8dc   :  { %v2621_v2 = vadd.f32 %v2620_v20, %v2619_v57  ;;  %v2641_v3 = vadd.f32 %v2640_v63, %v2636_v61 }
 0x8dd   :  { %v2628_v4 = vrot.slane %v2627_v0, 1  ;;  %v2648_v6 = vrot.slane %v2647_v1, 2 }
 0x8de   :  { %v2622_v7 = vrot.slane %v2621_v2, 1  ;;  %v2642_v8 = vrot.slane %v2641_v3, 2 }
 0x8df   :  { %v2629_v9 = vadd.f32 %v2628_v4, %v2627_v0  ;;  %v2649_v10 = vadd.f32 %v2648_v6, %v2647_v1 }
 0x8e0   :  { %v2623_v11 = vadd.f32 %v2622_v7, %v2621_v2  ;;  %v2643_v13 = vadd.f32 %v2642_v8, %v2641_v3 }
 0x8e1   :  { %v2631_v14 = vmul.f32 0.00390625, %v2629_v9  ;;  %v2650_v15 = vrot.slane %v2649_v10, 1 }
 0x8e2   :  { %v2630_v16 = vmul.f32 0.00390625, %v2623_v11  ;;  %v2644_v17 = vrot.slane %v2643_v13, 1 }
 0x8e3   :  { %v2651_v35 = vadd.f32 %v2650_v15, %v2649_v10  ;;  %v2655_v19 = vmul.f32 %v2631_v14, %v2631_v14  ;;  %v2663_v27 = vsub.f32 %v2611_v44, %v2631_v14 }
 0x8e4   :  { %v2645_v18 = vadd.f32 %v2644_v17, %v2643_v13  ;;  %v2654_v12 = vmul.f32 %v2630_v16, %v2630_v16  ;;  %v2662_v62 = vsub.f32 %v2610_v45, %v2630_v16 }
 0x8e5   :  { %v2653_v21 = vmul.f32 0.00390625, %v2651_v35 }
 0x8e6   :  { %v2652_v22 = vmul.f32 0.00390625, %v2645_v18 }
 0x8e7   :  { %v2657_v23 = vsub.f32 %v2653_v21, %v2655_v19 }
 0x8e8   :  { %v2656_v24 = vsub.f32 %v2652_v22, %v2654_v12 }
 0x8e9   :  { %v2659_v25 = vadd.f32 1e-05, %v2657_v23 }
 0x8ea   :  { %v2658_v26 = vadd.f32 1e-05, %v2656_v24 }
 0x8eb   :  { %3145 = vrsqrt.f32 %v2659_v25 }
 0x8ec   :  { %3147 = vrsqrt.f32 %v2658_v26 }
 0x8f5   :  { %v3146_v28 = vpop.eup %3145 }
 0x8f6   :  { %v3148_v30 = vpop.eup %3147  ;;  %v2665_v31 = vmul.f32 %v3146_v28, %v2663_v27 }
 0x8f7   :  { %v2664_v32 = vmul.f32 %v3148_v30, %v2662_v62 }
 0x8f8   :  { %v2667_v33 = vmul.f32 %v2665_v31, %v2608_v29 }
 0x8f9   :  { %v2666_v34 = vmul.f32 %v2664_v32, %v2608_v29 }
 0x8fa   :  { %v2669_v36 = vadd.f32 %v2667_v33, %v2609_v5 }
 0x8fb   :  { %v2668_v37 = vadd.f32 %v2666_v34, %v2609_v5 }
 0x8fc   :  { %2671 = vst.msk [vmem:[#allocation17 + $0x8] sm:$0xff] %vm178_vm0, %v2669_v36 }
 0x8fd   :  { %2670 = vst.msk [vmem:[#allocation17] sm:$0xff] %vm178_vm0, %v2668_v37 }
 0x8fe   :  { %3358 = shalt.err (!%p3355_p6)
}
 0x8ff   :  { %s3359_s4 = scalar_lea.hbm %s3949_s17, 256 }
 0x900   :  { %p3360_p7 = scmp.ne.s32.totalorder %s3949_s17, %s3359_s4  ;;  %p3363_p8 = scmp.lt.u32.totalorder %s3359_s4, %s3949_s17 }
 0x902   :  { %p3365_p9 = pnand %p3363_p8, %p3360_p7 }
 0x904   :  { %3368 = shalt.err (!%p3365_p9)
}
 0x905   :  { %2683 = dma.vmem_to_hbm [thread:$0]  %s2678_s1, 256, %s3949_s17, [#allocation4], %s3385_s27, %s3385_s27, %s3386_s19  }
 0x906   :  { %3379 = dma.done.wait [#allocation4], 256  }
 0x907   :  { %3380 = vsyncadd [#allocation4], 4294967040 }
 0x908   :  { %2687 = vsyncpa [#allocation3], 1 }
 0x909   :  { %2688 = vsyncpa [#allocation6], 1 }
 0x90a   :  { %2689 = vsyncpa [#allocation9], 1 }
 0x90b   :  { %2690 = vsyncpa [#allocation12], 1 }
 0x90c   :  { %2691 = vsyncpa [#allocation15], 1 }
 0x90d   :  { %2692 = vsyncpa [#allocation4], 1 }

</bundles_post_ra>
